<compile_context>
chip_gen: v6e
topology: v6e:2x2x1
jax: 0.10.0
libtpu: 0.0.40
codegen_flags: <defaults>
</compile_context>

<pallas_src>
import functools
import math

import jax
import jax.numpy as jnp
from jax.experimental import pallas as pl
from jax.experimental.pallas import tpu as pltpu

# ---- small synthetic BERT config (bert-base-cased scaled down) ----
VOCAB = 64
HIDDEN = 32
N_HEADS = 2
HEAD_DIM = HIDDEN // N_HEADS
N_LAYERS = 2
INTERMEDIATE = 64
MAX_POS = 16
TYPE_VOCAB = 2
NUM_LABELS = 2
LN_EPS = 1e-12


# ---------------- in-kernel helpers (pure jnp, f32) ----------------
def _layernorm(x, g, b, eps):
    mean = jnp.mean(x, axis=-1, keepdims=True)
    centered = x - mean
    var = jnp.mean(centered * centered, axis=-1, keepdims=True)
    return centered * jax.lax.rsqrt(var + eps) * g + b


def _gelu(x):
    # TODO(synk): tanh-approximate GELU (HF BERT uses erf GELU); numerically very close.
    return 0.5 * x * (1.0 + jnp.tanh(0.7978845608028654 * (x + 0.044715 * x * x * x)))


# ---------------- the single fused BERT kernel ----------------
def _bert_kernel(emb_ref, eg_ref, eb_ref,
                 wqkv_ref, bqkv_ref, wo_ref, bo_ref, ln1g_ref, ln1b_ref,
                 wi_ref, bi_ref, wo2_ref, bo2_ref, ln2g_ref, ln2b_ref,
                 pw_ref, pb_ref, cw_ref, cb_ref,
                 logits_ref, h_scr,
                 *, batch, seq, n_heads, head_dim, hidden, eps):
    l = pl.program_id(0)

    # ---- prologue (layer 0): embeddings LayerNorm into the resident VMEM scratch ----
    @pl.when(l == 0)
    def _():
        h_scr[...] = _layernorm(emb_ref[...], eg_ref[...], eb_ref[...], eps)

    h = h_scr[...]                                       # (B*S, H) f32, resident across layers
    h_bf = h.astype(jnp.bfloat16)

    # ---- fused QKV projection: one lane-dense (B*S, 3H) MXU matmul ----
    # (Wq / bq already carry the 1/sqrt(head_dim) attention scale, folded at init time.)
    qkv = jnp.dot(h_bf, wqkv_ref[0], preferred_element_type=jnp.float32) + bqkv_ref[0]

    # ---- multi-head self-attention (static tiny loops over batch & heads) ----
    ctx_rows = []
    for b in range(batch):                               # static
        r0 = b * seq                                     # sublane-aligned (seq = 8)
        head_ctx = []
        for hh in range(n_heads):                        # static
            c0 = hh * head_dim
            q = qkv[r0:r0 + seq, c0:c0 + head_dim]
            k = qkv[r0:r0 + seq, hidden + c0:hidden + c0 + head_dim]
            v = qkv[r0:r0 + seq, 2 * hidden + c0:2 * hidden + c0 + head_dim]
            s = jax.lax.dot_general(
                q.astype(jnp.bfloat16), k.astype(jnp.bfloat16),
                dimension_numbers=(((1,), (1,)), ((), ())),
                preferred_element_type=jnp.float32)      # (S, S), already scaled
            s = s - jnp.max(s, axis=-1, keepdims=True)
            p = jnp.exp(s)
            p = p * pl.reciprocal(jnp.sum(p, axis=-1, keepdims=True), approx=True)
            head_ctx.append(jnp.dot(p.astype(jnp.bfloat16), v.astype(jnp.bfloat16),
                                    preferred_element_type=jnp.float32))   # (S, dh)
        ctx_rows.append(jnp.concatenate(head_ctx, axis=1))                 # (S, H)
    ctx = jnp.concatenate(ctx_rows, axis=0)                                # (B*S, H)

    # ---- single attention output projection + residual + LayerNorm 1 ----
    attn = jnp.dot(ctx.astype(jnp.bfloat16), wo_ref[0],
                   preferred_element_type=jnp.float32) + bo_ref[0]
    h1 = _layernorm(attn + h, ln1g_ref[0], ln1b_ref[0], eps)

    # ---- FFN (dense -> GELU -> dense) + residual + LayerNorm 2 ----
    inter = _gelu(jnp.dot(h1.astype(jnp.bfloat16), wi_ref[0],
                          preferred_element_type=jnp.float32) + bi_ref[0])
    ffn = jnp.dot(inter.astype(jnp.bfloat16), wo2_ref[0],
                  preferred_element_type=jnp.float32) + bo2_ref[0]
    h2 = _layernorm(ffn + h1, ln2g_ref[0], ln2b_ref[0], eps)
    h_scr[...] = h2                                      # carry to the next layer step

    # ---- epilogue (last layer): pooler (tanh on [CLS]) + classifier ----
    @pl.when(l == pl.num_programs(0) - 1)
    def _():
        cls_tok = jnp.concatenate(
            [h2[b * seq:b * seq + 1, :] for b in range(batch)], axis=0)    # (B, H)
        pooled = jnp.tanh(jnp.dot(cls_tok.astype(jnp.bfloat16), pw_ref[...],
                                  preferred_element_type=jnp.float32) + pb_ref[...])
        logits_ref[...] = jnp.dot(pooled.astype(jnp.bfloat16), cw_ref[...],
                                  preferred_element_type=jnp.float32) + cb_ref[...]


def bert_encoder_fused(params, emb_sum, *, batch, seq):
    H = HIDDEN
    kernel = functools.partial(
        _bert_kernel, batch=batch, seq=seq, n_heads=N_HEADS,
        head_dim=HEAD_DIM, hidden=H, eps=LN_EPS)

    def rep(a):                    # small array, same whole block every layer step
        nd = a.ndim
        return pl.BlockSpec(a.shape, lambda l, nd=nd: (0,) * nd)

    def per_layer(a):              # stacked (L, ...) weight: block l streamed per grid step
        return pl.BlockSpec((1,) + a.shape[1:], lambda l: (l, 0, 0))

    in_specs = [
        rep(emb_sum), rep(params["emb_ln_g"]), rep(params["emb_ln_b"]),
        per_layer(params["wqkv"]), per_layer(params["bqkv"]),
        per_layer(params["wo"]), per_layer(params["bo"]),
        per_layer(params["ln1_g"]), per_layer(params["ln1_b"]),
        per_layer(params["wi"]), per_layer(params["bi"]),
        per_layer(params["wo2"]), per_layer(params["bo2"]),
        per_layer(params["ln2_g"]), per_layer(params["ln2_b"]),
        rep(params["pool_w"]), rep(params["pool_b"]),
        rep(params["cls_w"]), rep(params["cls_b"]),
    ]
    return pl.pallas_call(
        kernel,
        out_shape=jax.ShapeDtypeStruct((batch, NUM_LABELS), jnp.float32),
        grid=(N_LAYERS,),
        in_specs=in_specs,
        out_specs=pl.BlockSpec((batch, NUM_LABELS), lambda l: (0, 0)),
        scratch_shapes=[pltpu.VMEM((batch * seq, H), jnp.float32)],
        # layer axis carries a sequential dependency through the scratch -> "arbitrary".
        # (A leading size-B "parallel" axis could be added for v7x megacore; at this toy
        #  config the serial-loop overhead on v5e/v6e outweighs it.)
        compiler_params=pltpu.CompilerParams(dimension_semantics=("arbitrary",)),
    )(emb_sum, params["emb_ln_g"], params["emb_ln_b"],
      params["wqkv"], params["bqkv"], params["wo"], params["bo"],
      params["ln1_g"], params["ln1_b"], params["wi"], params["bi"],
      params["wo2"], params["bo2"], params["ln2_g"], params["ln2_b"],
      params["pool_w"], params["pool_b"], params["cls_w"], params["cls_b"])


# ---------------- parameter init (deterministic, synthetic, layer-stacked) ----------------
def init_params(key):
    std = 0.02
    keys = iter(jax.random.split(key, 64))

    def nrm(shape):
        return std * jax.random.normal(next(keys), shape, dtype=jnp.float32)

    inv_sqrt_dh = 1.0 / math.sqrt(HEAD_DIM)

    wqkv, bqkv, wo, bo = [], [], [], []
    ln1g, ln1b, wi, bi, wo2, bo2, ln2g, ln2b = ([] for _ in range(8))
    for _ in range(N_LAYERS):
        wq, wk, wv = nrm((HIDDEN, HIDDEN)), nrm((HIDDEN, HIDDEN)), nrm((HIDDEN, HIDDEN))
        # Fold the 1/sqrt(head_dim) attention scale into Wq (and bq, zero here):
        #   (x Wq/sqrt(d) + bq/sqrt(d)) (x Wk + bk)^T  ==  [(x Wq + bq)(x Wk + bk)^T] / sqrt(d)
        wqkv.append(jnp.concatenate([wq * inv_sqrt_dh, wk, wv], axis=1).astype(jnp.bfloat16))
        bqkv.append(jnp.zeros((1, 3 * HIDDEN), jnp.float32))
        wo.append(nrm((HIDDEN, HIDDEN)).astype(jnp.bfloat16))
        bo.append(jnp.zeros((1, HIDDEN), jnp.float32))
        ln1g.append(jnp.ones((1, HIDDEN), jnp.float32))
        ln1b.append(jnp.zeros((1, HIDDEN), jnp.float32))
        wi.append(nrm((HIDDEN, INTERMEDIATE)).astype(jnp.bfloat16))
        bi.append(jnp.zeros((1, INTERMEDIATE), jnp.float32))
        wo2.append(nrm((INTERMEDIATE, HIDDEN)).astype(jnp.bfloat16))
        bo2.append(jnp.zeros((1, HIDDEN), jnp.float32))
        ln2g.append(jnp.ones((1, HIDDEN), jnp.float32))
        ln2b.append(jnp.zeros((1, HIDDEN), jnp.float32))

    stack = lambda xs: jnp.stack(xs, axis=0)
    return {
        "word_emb": nrm((VOCAB, HIDDEN)),
        "pos_emb": nrm((MAX_POS, HIDDEN)),
        "type_emb": nrm((TYPE_VOCAB, HIDDEN)),
        "emb_ln_g": jnp.ones((1, HIDDEN), jnp.float32),
        "emb_ln_b": jnp.zeros((1, HIDDEN), jnp.float32),
        "wqkv": stack(wqkv), "bqkv": stack(bqkv),
        "wo": stack(wo), "bo": stack(bo),
        "ln1_g": stack(ln1g), "ln1_b": stack(ln1b),
        "wi": stack(wi), "bi": stack(bi),
        "wo2": stack(wo2), "bo2": stack(bo2),
        "ln2_g": stack(ln2g), "ln2_b": stack(ln2b),
        "pool_w": nrm((HIDDEN, HIDDEN)).astype(jnp.bfloat16),
        "pool_b": jnp.zeros((1, HIDDEN), jnp.float32),
        "cls_w": nrm((HIDDEN, NUM_LABELS)).astype(jnp.bfloat16),
        "cls_b": jnp.zeros((1, NUM_LABELS), jnp.float32),
    }


# ---------------- forward: (loss, logits) like BertForSequenceClassification ----------------
def bert_forward(params, text, labels):
    B, S = text.shape
    H = HIDDEN

    # embeddings: gather is glue; the add + LayerNorm is fused into the kernel prologue
    word = jnp.take(params["word_emb"], text.reshape(-1), axis=0)            # (B*S, H)
    pos_plus_type = params["pos_emb"][:S] + params["type_emb"][0][None, :]   # token_type_ids=None -> 0
    emb_sum = word + jnp.broadcast_to(pos_plus_type[None], (B, S, H)).reshape(B * S, H)

    # whole encoder + pooler + classifier: ONE pallas_call
    logits = bert_encoder_fused(params, emb_sum, batch=B, seq=S)             # (B, NUM_LABELS)

    # cross-entropy loss (mean over batch), matches nn.CrossEntropyLoss on integer labels
    logp = jax.nn.log_softmax(logits, axis=-1)
    loss = -jnp.mean(jnp.take_along_axis(logp, labels[:, None], axis=-1))
    # TODO(synk): dropout omitted (deterministic / eval semantics); no attention_mask handling
    # (all tokens attend), matching the reference call that passes no mask.
    return loss, logits


if __name__ == "__main__":
    key = jax.random.PRNGKey(0)
    pkey, tkey, lkey = jax.random.split(key, 3)
    params = init_params(pkey)

    B, S = 2, 8
    text = jax.random.randint(tkey, (B, S), 0, VOCAB, dtype=jnp.int32)
    label = jax.random.randint(lkey, (B,), 0, NUM_LABELS, dtype=jnp.int32)

    fwd = jax.jit(bert_forward)
    loss, logits = fwd(params, text, label)
    jax.block_until_ready((loss, logits))
    assert logits.shape == (B, NUM_LABELS)
    print("KERNEL_OK")
</pallas_src>

<mosaic_0001>
module attributes {stable_mosaic.version = 11 : i64} {
  func.func @_bert_kernel(%arg0: i32, %arg1: memref<16x32xf32, #tpu.memory_space<vmem>>, %arg2: memref<1x32xf32, #tpu.memory_space<vmem>>, %arg3: memref<1x32xf32, #tpu.memory_space<vmem>>, %arg4: memref<1x32x96xbf16, #tpu.memory_space<vmem>>, %arg5: memref<1x1x96xf32, #tpu.memory_space<vmem>>, %arg6: memref<1x32x32xbf16, #tpu.memory_space<vmem>>, %arg7: memref<1x1x32xf32, #tpu.memory_space<vmem>>, %arg8: memref<1x1x32xf32, #tpu.memory_space<vmem>>, %arg9: memref<1x1x32xf32, #tpu.memory_space<vmem>>, %arg10: memref<1x32x64xbf16, #tpu.memory_space<vmem>>, %arg11: memref<1x1x64xf32, #tpu.memory_space<vmem>>, %arg12: memref<1x64x32xbf16, #tpu.memory_space<vmem>>, %arg13: memref<1x1x32xf32, #tpu.memory_space<vmem>>, %arg14: memref<1x1x32xf32, #tpu.memory_space<vmem>>, %arg15: memref<1x1x32xf32, #tpu.memory_space<vmem>>, %arg16: memref<32x32xbf16, #tpu.memory_space<vmem>>, %arg17: memref<1x32xf32, #tpu.memory_space<vmem>>, %arg18: memref<32x2xbf16, #tpu.memory_space<vmem>>, %arg19: memref<1x2xf32, #tpu.memory_space<vmem>>, %arg20: memref<2x2xf32, #tpu.memory_space<vmem>>, %arg21: memref<16x32xf32, #tpu.memory_space<vmem>>) attributes {dimension_semantics = [#tpu.dimension_semantics<arbitrary>], iteration_bounds = array<i64: 2>, scalar_prefetch = 0 : i64, scratch_operands = 1 : i64, tpu.core_type = #tpu.core_type<tc>, window_params = [{pipeline_mode = #tpu.pipeline_mode<synchronous>, transform_indices = @transform_0, window_bounds = array<i64: 16, 32>}, {pipeline_mode = #tpu.pipeline_mode<synchronous>, transform_indices = @transform_1, window_bounds = array<i64: 1, 32>}, {pipeline_mode = #tpu.pipeline_mode<synchronous>, transform_indices = @transform_2, window_bounds = array<i64: 1, 32>}, {transform_indices = @transform_3, window_bounds = array<i64: 1, 32, 96>}, {transform_indices = @transform_4, window_bounds = array<i64: 1, 1, 96>}, {transform_indices = @transform_5, window_bounds = array<i64: 1, 32, 32>}, {transform_indices = @transform_6, window_bounds = array<i64: 1, 1, 32>}, {transform_indices = @transform_7, window_bounds = array<i64: 1, 1, 32>}, {transform_indices = @transform_8, window_bounds = array<i64: 1, 1, 32>}, {transform_indices = @transform_9, window_bounds = array<i64: 1, 32, 64>}, {transform_indices = @transform_10, window_bounds = array<i64: 1, 1, 64>}, {transform_indices = @transform_11, window_bounds = array<i64: 1, 64, 32>}, {transform_indices = @transform_12, window_bounds = array<i64: 1, 1, 32>}, {transform_indices = @transform_13, window_bounds = array<i64: 1, 1, 32>}, {transform_indices = @transform_14, window_bounds = array<i64: 1, 1, 32>}, {pipeline_mode = #tpu.pipeline_mode<synchronous>, transform_indices = @transform_15, window_bounds = array<i64: 32, 32>}, {pipeline_mode = #tpu.pipeline_mode<synchronous>, transform_indices = @transform_16, window_bounds = array<i64: 1, 32>}, {pipeline_mode = #tpu.pipeline_mode<synchronous>, transform_indices = @transform_17, window_bounds = array<i64: 32, 2>}, {pipeline_mode = #tpu.pipeline_mode<synchronous>, transform_indices = @transform_18, window_bounds = array<i64: 1, 2>}, {pipeline_mode = #tpu.pipeline_mode<synchronous>, transform_indices = @transform_19, window_bounds = array<i64: 2, 2>}]} {
    %c0_i32 = arith.constant 0 : i32
    %0 = arith.cmpi eq, %arg0, %c0_i32 : i32
    %1 = arith.extui %0 : i1 to i32
    %c0_i32_0 = arith.constant 0 : i32
    %2 = arith.cmpi ne, %1, %c0_i32_0 : i32
    scf.if %2 {
      %c0_74 = arith.constant 0 : index
      %c0_75 = arith.constant 0 : index
      %182 = vector.load %arg1[%c0_74, %c0_75] : memref<16x32xf32, #tpu.memory_space<vmem>>, vector<16x32xf32>
      %c0_76 = arith.constant 0 : index
      %c0_77 = arith.constant 0 : index
      %183 = vector.load %arg2[%c0_76, %c0_77] : memref<1x32xf32, #tpu.memory_space<vmem>>, vector<1x32xf32>
      %c0_78 = arith.constant 0 : index
      %c0_79 = arith.constant 0 : index
      %184 = vector.load %arg3[%c0_78, %c0_79] : memref<1x32xf32, #tpu.memory_space<vmem>>, vector<1x32xf32>
      %cst_80 = arith.constant dense<0.000000e+00> : vector<16xf32>
      %185 = vector.multi_reduction <add>, %182, %cst_80 [1] : vector<16x32xf32> to vector<16xf32>
      %186 = vector.shape_cast %185 : vector<16xf32> to vector<16x1xf32>
      %cst_81 = arith.constant 3.200000e+01 : f32
      %187 = vector.broadcast %cst_81 : f32 to vector<16x1xf32>
      %188 = arith.divf %186, %187 : vector<16x1xf32>
      %189 = vector.broadcast %188 : vector<16x1xf32> to vector<16x32xf32>
      %190 = arith.subf %182, %189 : vector<16x32xf32>
      %191 = arith.mulf %190, %190 : vector<16x32xf32>
      %cst_82 = arith.constant dense<0.000000e+00> : vector<16xf32>
      %192 = vector.multi_reduction <add>, %191, %cst_82 [1] : vector<16x32xf32> to vector<16xf32>
      %193 = vector.shape_cast %192 : vector<16xf32> to vector<16x1xf32>
      %cst_83 = arith.constant 3.200000e+01 : f32
      %194 = vector.broadcast %cst_83 : f32 to vector<16x1xf32>
      %195 = arith.divf %193, %194 : vector<16x1xf32>
      %cst_84 = arith.constant 9.99999996E-13 : f32
      %196 = vector.broadcast %cst_84 : f32 to vector<16x1xf32>
      %197 = arith.addf %195, %196 : vector<16x1xf32>
      %198 = math.rsqrt %197 : vector<16x1xf32>
      %199 = vector.broadcast %198 : vector<16x1xf32> to vector<16x32xf32>
      %200 = arith.mulf %190, %199 : vector<16x32xf32>
      %201 = vector.broadcast %183 : vector<1x32xf32> to vector<16x32xf32>
      %202 = arith.mulf %200, %201 : vector<16x32xf32>
      %203 = vector.broadcast %184 : vector<1x32xf32> to vector<16x32xf32>
      %204 = arith.addf %202, %203 : vector<16x32xf32>
      %c0_85 = arith.constant 0 : index
      %c0_86 = arith.constant 0 : index
      %205 = vector.load %arg21[%c0_85, %c0_86] : memref<16x32xf32, #tpu.memory_space<vmem>>, vector<16x32xf32>
      tpu.vector_store %arg21[%c0_85, %c0_86], %204 {strides = array<i32>} : memref<16x32xf32, #tpu.memory_space<vmem>>, vector<16x32xf32>,
    } else {
    }
    %c0 = arith.constant 0 : index
    %c0_1 = arith.constant 0 : index
    %3 = vector.load %arg21[%c0, %c0_1] : memref<16x32xf32, #tpu.memory_space<vmem>>, vector<16x32xf32>
    %4 = arith.truncf %3 : vector<16x32xf32> to vector<16x32xbf16>
    %c0_2 = arith.constant 0 : index
    %c0_3 = arith.constant 0 : index
    %c0_4 = arith.constant 0 : index
    %5 = vector.load %arg4[%c0_2, %c0_3, %c0_4] : memref<1x32x96xbf16, #tpu.memory_space<vmem>>, vector<1x32x96xbf16>
    %6 = vector.shape_cast %5 : vector<1x32x96xbf16> to vector<32x96xbf16>
    %cst = arith.constant dense<0.000000e+00> : vector<16x96xf32>
    %7 = tpu.matmul %4, %6, %cst {dimension_numbers = #tpu.dot_dimension_numbers<[1], [0], [0], [1], [0, 0, 1, 1], [], []>} : vector<16x32xbf16>, vector<32x96xbf16>, vector<16x96xf32> -> vector<16x96xf32>
    %c0_5 = arith.constant 0 : index
    %c0_6 = arith.constant 0 : index
    %c0_7 = arith.constant 0 : index
    %8 = vector.load %arg5[%c0_5, %c0_6, %c0_7] : memref<1x1x96xf32, #tpu.memory_space<vmem>>, vector<1x1x96xf32>
    %9 = vector.shape_cast %8 : vector<1x1x96xf32> to vector<1x96xf32>
    %10 = vector.broadcast %9 : vector<1x96xf32> to vector<16x96xf32>
    %11 = arith.addf %7, %10 : vector<16x96xf32>
    %12 = vector.extract_strided_slice %11 {offsets = [0, 0], sizes = [8, 16], strides = [1, 1]} : vector<16x96xf32> to vector<8x16xf32>
    %13 = vector.extract_strided_slice %11 {offsets = [0, 32], sizes = [8, 16], strides = [1, 1]} : vector<16x96xf32> to vector<8x16xf32>
    %14 = vector.extract_strided_slice %11 {offsets = [0, 64], sizes = [8, 16], strides = [1, 1]} : vector<16x96xf32> to vector<8x16xf32>
    %15 = arith.truncf %12 : vector<8x16xf32> to vector<8x16xbf16>
    %16 = arith.truncf %13 : vector<8x16xf32> to vector<8x16xbf16>
    %cst_8 = arith.constant dense<0.000000e+00> : vector<8x8xf32>
    %17 = tpu.matmul %15, %16, %cst_8 {dimension_numbers = #tpu.dot_dimension_numbers<[1], [1], [0], [0], [0, 0, 1, 0], [], []>} : vector<8x16xbf16>, vector<8x16xbf16>, vector<8x8xf32> -> vector<8x8xf32>
    %cst_9 = arith.constant dense<0xFF800000> : vector<8xf32>
    %18 = vector.multi_reduction <maximumf>, %17, %cst_9 [1] : vector<8x8xf32> to vector<8xf32>
    %19 = vector.shape_cast %18 : vector<8xf32> to vector<8x1xf32>
    %20 = vector.broadcast %19 : vector<8x1xf32> to vector<8x8xf32>
    %21 = arith.subf %17, %20 : vector<8x8xf32>
    %22 = math.exp %21 : vector<8x8xf32>
    %cst_10 = arith.constant dense<0.000000e+00> : vector<8xf32>
    %23 = vector.multi_reduction <add>, %22, %cst_10 [1] : vector<8x8xf32> to vector<8xf32>
    %24 = vector.shape_cast %23 : vector<8xf32> to vector<8x1xf32>
    %25 = tpu.reciprocal %24 {approx = true} : vector<8x1xf32> -> vector<8x1xf32>
    %26 = vector.broadcast %25 : vector<8x1xf32> to vector<8x8xf32>
    %27 = arith.mulf %22, %26 : vector<8x8xf32>
    %28 = arith.truncf %27 : vector<8x8xf32> to vector<8x8xbf16>
    %29 = arith.truncf %14 : vector<8x16xf32> to vector<8x16xbf16>
    %cst_11 = arith.constant dense<0.000000e+00> : vector<8x16xf32>
    %30 = tpu.matmul %28, %29, %cst_11 {dimension_numbers = #tpu.dot_dimension_numbers<[1], [0], [0], [1], [0, 0, 1, 1], [], []>} : vector<8x8xbf16>, vector<8x16xbf16>, vector<8x16xf32> -> vector<8x16xf32>
    %31 = vector.extract_strided_slice %11 {offsets = [0, 16], sizes = [8, 16], strides = [1, 1]} : vector<16x96xf32> to vector<8x16xf32>
    %32 = vector.extract_strided_slice %11 {offsets = [0, 48], sizes = [8, 16], strides = [1, 1]} : vector<16x96xf32> to vector<8x16xf32>
    %33 = vector.extract_strided_slice %11 {offsets = [0, 80], sizes = [8, 16], strides = [1, 1]} : vector<16x96xf32> to vector<8x16xf32>
    %34 = arith.truncf %31 : vector<8x16xf32> to vector<8x16xbf16>
    %35 = arith.truncf %32 : vector<8x16xf32> to vector<8x16xbf16>
    %cst_12 = arith.constant dense<0.000000e+00> : vector<8x8xf32>
    %36 = tpu.matmul %34, %35, %cst_12 {dimension_numbers = #tpu.dot_dimension_numbers<[1], [1], [0], [0], [0, 0, 1, 0], [], []>} : vector<8x16xbf16>, vector<8x16xbf16>, vector<8x8xf32> -> vector<8x8xf32>
    %cst_13 = arith.constant dense<0xFF800000> : vector<8xf32>
    %37 = vector.multi_reduction <maximumf>, %36, %cst_13 [1] : vector<8x8xf32> to vector<8xf32>
    %38 = vector.shape_cast %37 : vector<8xf32> to vector<8x1xf32>
    %39 = vector.broadcast %38 : vector<8x1xf32> to vector<8x8xf32>
    %40 = arith.subf %36, %39 : vector<8x8xf32>
    %41 = math.exp %40 : vector<8x8xf32>
    %cst_14 = arith.constant dense<0.000000e+00> : vector<8xf32>
    %42 = vector.multi_reduction <add>, %41, %cst_14 [1] : vector<8x8xf32> to vector<8xf32>
    %43 = vector.shape_cast %42 : vector<8xf32> to vector<8x1xf32>
    %44 = tpu.reciprocal %43 {approx = true} : vector<8x1xf32> -> vector<8x1xf32>
    %45 = vector.broadcast %44 : vector<8x1xf32> to vector<8x8xf32>
    %46 = arith.mulf %41, %45 : vector<8x8xf32>
    %47 = arith.truncf %46 : vector<8x8xf32> to vector<8x8xbf16>
    %48 = arith.truncf %33 : vector<8x16xf32> to vector<8x16xbf16>
    %cst_15 = arith.constant dense<0.000000e+00> : vector<8x16xf32>
    %49 = tpu.matmul %47, %48, %cst_15 {dimension_numbers = #tpu.dot_dimension_numbers<[1], [0], [0], [1], [0, 0, 1, 1], [], []>} : vector<8x8xbf16>, vector<8x16xbf16>, vector<8x16xf32> -> vector<8x16xf32>
    %50 = tpu.concatenate %30, %49 in 1 : vector<8x16xf32>, vector<8x16xf32> -> vector<8x32xf32>
    %51 = vector.extract_strided_slice %11 {offsets = [8, 0], sizes = [8, 16], strides = [1, 1]} : vector<16x96xf32> to vector<8x16xf32>
    %52 = vector.extract_strided_slice %11 {offsets = [8, 32], sizes = [8, 16], strides = [1, 1]} : vector<16x96xf32> to vector<8x16xf32>
    %53 = vector.extract_strided_slice %11 {offsets = [8, 64], sizes = [8, 16], strides = [1, 1]} : vector<16x96xf32> to vector<8x16xf32>
    %54 = arith.truncf %51 : vector<8x16xf32> to vector<8x16xbf16>
    %55 = arith.truncf %52 : vector<8x16xf32> to vector<8x16xbf16>
    %cst_16 = arith.constant dense<0.000000e+00> : vector<8x8xf32>
    %56 = tpu.matmul %54, %55, %cst_16 {dimension_numbers = #tpu.dot_dimension_numbers<[1], [1], [0], [0], [0, 0, 1, 0], [], []>} : vector<8x16xbf16>, vector<8x16xbf16>, vector<8x8xf32> -> vector<8x8xf32>
    %cst_17 = arith.constant dense<0xFF800000> : vector<8xf32>
    %57 = vector.multi_reduction <maximumf>, %56, %cst_17 [1] : vector<8x8xf32> to vector<8xf32>
    %58 = vector.shape_cast %57 : vector<8xf32> to vector<8x1xf32>
    %59 = vector.broadcast %58 : vector<8x1xf32> to vector<8x8xf32>
    %60 = arith.subf %56, %59 : vector<8x8xf32>
    %61 = math.exp %60 : vector<8x8xf32>
    %cst_18 = arith.constant dense<0.000000e+00> : vector<8xf32>
    %62 = vector.multi_reduction <add>, %61, %cst_18 [1] : vector<8x8xf32> to vector<8xf32>
    %63 = vector.shape_cast %62 : vector<8xf32> to vector<8x1xf32>
    %64 = tpu.reciprocal %63 {approx = true} : vector<8x1xf32> -> vector<8x1xf32>
    %65 = vector.broadcast %64 : vector<8x1xf32> to vector<8x8xf32>
    %66 = arith.mulf %61, %65 : vector<8x8xf32>
    %67 = arith.truncf %66 : vector<8x8xf32> to vector<8x8xbf16>
    %68 = arith.truncf %53 : vector<8x16xf32> to vector<8x16xbf16>
    %cst_19 = arith.constant dense<0.000000e+00> : vector<8x16xf32>
    %69 = tpu.matmul %67, %68, %cst_19 {dimension_numbers = #tpu.dot_dimension_numbers<[1], [0], [0], [1], [0, 0, 1, 1], [], []>} : vector<8x8xbf16>, vector<8x16xbf16>, vector<8x16xf32> -> vector<8x16xf32>
    %70 = vector.extract_strided_slice %11 {offsets = [8, 16], sizes = [8, 16], strides = [1, 1]} : vector<16x96xf32> to vector<8x16xf32>
    %71 = vector.extract_strided_slice %11 {offsets = [8, 48], sizes = [8, 16], strides = [1, 1]} : vector<16x96xf32> to vector<8x16xf32>
    %72 = vector.extract_strided_slice %11 {offsets = [8, 80], sizes = [8, 16], strides = [1, 1]} : vector<16x96xf32> to vector<8x16xf32>
    %73 = arith.truncf %70 : vector<8x16xf32> to vector<8x16xbf16>
    %74 = arith.truncf %71 : vector<8x16xf32> to vector<8x16xbf16>
    %cst_20 = arith.constant dense<0.000000e+00> : vector<8x8xf32>
    %75 = tpu.matmul %73, %74, %cst_20 {dimension_numbers = #tpu.dot_dimension_numbers<[1], [1], [0], [0], [0, 0, 1, 0], [], []>} : vector<8x16xbf16>, vector<8x16xbf16>, vector<8x8xf32> -> vector<8x8xf32>
    %cst_21 = arith.constant dense<0xFF800000> : vector<8xf32>
    %76 = vector.multi_reduction <maximumf>, %75, %cst_21 [1] : vector<8x8xf32> to vector<8xf32>
    %77 = vector.shape_cast %76 : vector<8xf32> to vector<8x1xf32>
    %78 = vector.broadcast %77 : vector<8x1xf32> to vector<8x8xf32>
    %79 = arith.subf %75, %78 : vector<8x8xf32>
    %80 = math.exp %79 : vector<8x8xf32>
    %cst_22 = arith.constant dense<0.000000e+00> : vector<8xf32>
    %81 = vector.multi_reduction <add>, %80, %cst_22 [1] : vector<8x8xf32> to vector<8xf32>
    %82 = vector.shape_cast %81 : vector<8xf32> to vector<8x1xf32>
    %83 = tpu.reciprocal %82 {approx = true} : vector<8x1xf32> -> vector<8x1xf32>
    %84 = vector.broadcast %83 : vector<8x1xf32> to vector<8x8xf32>
    %85 = arith.mulf %80, %84 : vector<8x8xf32>
    %86 = arith.truncf %85 : vector<8x8xf32> to vector<8x8xbf16>
    %87 = arith.truncf %72 : vector<8x16xf32> to vector<8x16xbf16>
    %cst_23 = arith.constant dense<0.000000e+00> : vector<8x16xf32>
    %88 = tpu.matmul %86, %87, %cst_23 {dimension_numbers = #tpu.dot_dimension_numbers<[1], [0], [0], [1], [0, 0, 1, 1], [], []>} : vector<8x8xbf16>, vector<8x16xbf16>, vector<8x16xf32> -> vector<8x16xf32>
    %89 = tpu.concatenate %69, %88 in 1 : vector<8x16xf32>, vector<8x16xf32> -> vector<8x32xf32>
    %90 = tpu.concatenate %50, %89 in 0 : vector<8x32xf32>, vector<8x32xf32> -> vector<16x32xf32>
    %91 = arith.truncf %90 : vector<16x32xf32> to vector<16x32xbf16>
    %c0_24 = arith.constant 0 : index
    %c0_25 = arith.constant 0 : index
    %c0_26 = arith.constant 0 : index
    %92 = vector.load %arg6[%c0_24, %c0_25, %c0_26] : memref<1x32x32xbf16, #tpu.memory_space<vmem>>, vector<1x32x32xbf16>
    %93 = vector.shape_cast %92 : vector<1x32x32xbf16> to vector<32x32xbf16>
    %cst_27 = arith.constant dense<0.000000e+00> : vector<16x32xf32>
    %94 = tpu.matmul %91, %93, %cst_27 {dimension_numbers = #tpu.dot_dimension_numbers<[1], [0], [0], [1], [0, 0, 1, 1], [], []>} : vector<16x32xbf16>, vector<32x32xbf16>, vector<16x32xf32> -> vector<16x32xf32>
    %c0_28 = arith.constant 0 : index
    %c0_29 = arith.constant 0 : index
    %c0_30 = arith.constant 0 : index
    %95 = vector.load %arg7[%c0_28, %c0_29, %c0_30] : memref<1x1x32xf32, #tpu.memory_space<vmem>>, vector<1x1x32xf32>
    %96 = vector.shape_cast %95 : vector<1x1x32xf32> to vector<1x32xf32>
    %97 = vector.broadcast %96 : vector<1x32xf32> to vector<16x32xf32>
    %98 = arith.addf %94, %97 : vector<16x32xf32>
    %99 = arith.addf %98, %3 : vector<16x32xf32>
    %c0_31 = arith.constant 0 : index
    %c0_32 = arith.constant 0 : index
    %c0_33 = arith.constant 0 : index
    %100 = vector.load %arg8[%c0_31, %c0_32, %c0_33] : memref<1x1x32xf32, #tpu.memory_space<vmem>>, vector<1x1x32xf32>
    %101 = vector.shape_cast %100 : vector<1x1x32xf32> to vector<1x32xf32>
    %c0_34 = arith.constant 0 : index
    %c0_35 = arith.constant 0 : index
    %c0_36 = arith.constant 0 : index
    %102 = vector.load %arg9[%c0_34, %c0_35, %c0_36] : memref<1x1x32xf32, #tpu.memory_space<vmem>>, vector<1x1x32xf32>
    %103 = vector.shape_cast %102 : vector<1x1x32xf32> to vector<1x32xf32>
    %cst_37 = arith.constant dense<0.000000e+00> : vector<16xf32>
    %104 = vector.multi_reduction <add>, %99, %cst_37 [1] : vector<16x32xf32> to vector<16xf32>
    %105 = vector.shape_cast %104 : vector<16xf32> to vector<16x1xf32>
    %cst_38 = arith.constant 3.200000e+01 : f32
    %106 = vector.broadcast %cst_38 : f32 to vector<16x1xf32>
    %107 = arith.divf %105, %106 : vector<16x1xf32>
    %108 = vector.broadcast %107 : vector<16x1xf32> to vector<16x32xf32>
    %109 = arith.subf %99, %108 : vector<16x32xf32>
    %110 = arith.mulf %109, %109 : vector<16x32xf32>
    %cst_39 = arith.constant dense<0.000000e+00> : vector<16xf32>
    %111 = vector.multi_reduction <add>, %110, %cst_39 [1] : vector<16x32xf32> to vector<16xf32>
    %112 = vector.shape_cast %111 : vector<16xf32> to vector<16x1xf32>
    %cst_40 = arith.constant 3.200000e+01 : f32
    %113 = vector.broadcast %cst_40 : f32 to vector<16x1xf32>
    %114 = arith.divf %112, %113 : vector<16x1xf32>
    %cst_41 = arith.constant 9.99999996E-13 : f32
    %115 = vector.broadcast %cst_41 : f32 to vector<16x1xf32>
    %116 = arith.addf %114, %115 : vector<16x1xf32>
    %117 = math.rsqrt %116 : vector<16x1xf32>
    %118 = vector.broadcast %117 : vector<16x1xf32> to vector<16x32xf32>
    %119 = arith.mulf %109, %118 : vector<16x32xf32>
    %120 = vector.broadcast %101 : vector<1x32xf32> to vector<16x32xf32>
    %121 = arith.mulf %119, %120 : vector<16x32xf32>
    %122 = vector.broadcast %103 : vector<1x32xf32> to vector<16x32xf32>
    %123 = arith.addf %121, %122 : vector<16x32xf32>
    %124 = arith.truncf %123 : vector<16x32xf32> to vector<16x32xbf16>
    %c0_42 = arith.constant 0 : index
    %c0_43 = arith.constant 0 : index
    %c0_44 = arith.constant 0 : index
    %125 = vector.load %arg10[%c0_42, %c0_43, %c0_44] : memref<1x32x64xbf16, #tpu.memory_space<vmem>>, vector<1x32x64xbf16>
    %126 = vector.shape_cast %125 : vector<1x32x64xbf16> to vector<32x64xbf16>
    %cst_45 = arith.constant dense<0.000000e+00> : vector<16x64xf32>
    %127 = tpu.matmul %124, %126, %cst_45 {dimension_numbers = #tpu.dot_dimension_numbers<[1], [0], [0], [1], [0, 0, 1, 1], [], []>} : vector<16x32xbf16>, vector<32x64xbf16>, vector<16x64xf32> -> vector<16x64xf32>
    %c0_46 = arith.constant 0 : index
    %c0_47 = arith.constant 0 : index
    %c0_48 = arith.constant 0 : index
    %128 = vector.load %arg11[%c0_46, %c0_47, %c0_48] : memref<1x1x64xf32, #tpu.memory_space<vmem>>, vector<1x1x64xf32>
    %129 = vector.shape_cast %128 : vector<1x1x64xf32> to vector<1x64xf32>
    %130 = vector.broadcast %129 : vector<1x64xf32> to vector<16x64xf32>
    %131 = arith.addf %127, %130 : vector<16x64xf32>
    %cst_49 = arith.constant 5.000000e-01 : f32
    %132 = vector.broadcast %cst_49 : f32 to vector<16x64xf32>
    %133 = arith.mulf %132, %131 : vector<16x64xf32>
    %cst_50 = arith.constant 4.471500e-02 : f32
    %134 = vector.broadcast %cst_50 : f32 to vector<16x64xf32>
    %135 = arith.mulf %134, %131 : vector<16x64xf32>
    %136 = arith.mulf %135, %131 : vector<16x64xf32>
    %137 = arith.mulf %136, %131 : vector<16x64xf32>
    %138 = arith.addf %131, %137 : vector<16x64xf32>
    %cst_51 = arith.constant 0.797884583 : f32
    %139 = vector.broadcast %cst_51 : f32 to vector<16x64xf32>
    %140 = arith.mulf %139, %138 : vector<16x64xf32>
    %141 = math.tanh %140 : vector<16x64xf32>
    %cst_52 = arith.constant 1.000000e+00 : f32
    %142 = vector.broadcast %cst_52 : f32 to vector<16x64xf32>
    %143 = arith.addf %142, %141 : vector<16x64xf32>
    %144 = arith.mulf %133, %143 : vector<16x64xf32>
    %145 = arith.truncf %144 : vector<16x64xf32> to vector<16x64xbf16>
    %c0_53 = arith.constant 0 : index
    %c0_54 = arith.constant 0 : index
    %c0_55 = arith.constant 0 : index
    %146 = vector.load %arg12[%c0_53, %c0_54, %c0_55] : memref<1x64x32xbf16, #tpu.memory_space<vmem>>, vector<1x64x32xbf16>
    %147 = vector.shape_cast %146 : vector<1x64x32xbf16> to vector<64x32xbf16>
    %cst_56 = arith.constant dense<0.000000e+00> : vector<16x32xf32>
    %148 = tpu.matmul %145, %147, %cst_56 {dimension_numbers = #tpu.dot_dimension_numbers<[1], [0], [0], [1], [0, 0, 1, 1], [], []>} : vector<16x64xbf16>, vector<64x32xbf16>, vector<16x32xf32> -> vector<16x32xf32>
    %c0_57 = arith.constant 0 : index
    %c0_58 = arith.constant 0 : index
    %c0_59 = arith.constant 0 : index
    %149 = vector.load %arg13[%c0_57, %c0_58, %c0_59] : memref<1x1x32xf32, #tpu.memory_space<vmem>>, vector<1x1x32xf32>
    %150 = vector.shape_cast %149 : vector<1x1x32xf32> to vector<1x32xf32>
    %151 = vector.broadcast %150 : vector<1x32xf32> to vector<16x32xf32>
    %152 = arith.addf %148, %151 : vector<16x32xf32>
    %153 = arith.addf %152, %123 : vector<16x32xf32>
    %c0_60 = arith.constant 0 : index
    %c0_61 = arith.constant 0 : index
    %c0_62 = arith.constant 0 : index
    %154 = vector.load %arg14[%c0_60, %c0_61, %c0_62] : memref<1x1x32xf32, #tpu.memory_space<vmem>>, vector<1x1x32xf32>
    %155 = vector.shape_cast %154 : vector<1x1x32xf32> to vector<1x32xf32>
    %c0_63 = arith.constant 0 : index
    %c0_64 = arith.constant 0 : index
    %c0_65 = arith.constant 0 : index
    %156 = vector.load %arg15[%c0_63, %c0_64, %c0_65] : memref<1x1x32xf32, #tpu.memory_space<vmem>>, vector<1x1x32xf32>
    %157 = vector.shape_cast %156 : vector<1x1x32xf32> to vector<1x32xf32>
    %cst_66 = arith.constant dense<0.000000e+00> : vector<16xf32>
    %158 = vector.multi_reduction <add>, %153, %cst_66 [1] : vector<16x32xf32> to vector<16xf32>
    %159 = vector.shape_cast %158 : vector<16xf32> to vector<16x1xf32>
    %cst_67 = arith.constant 3.200000e+01 : f32
    %160 = vector.broadcast %cst_67 : f32 to vector<16x1xf32>
    %161 = arith.divf %159, %160 : vector<16x1xf32>
    %162 = vector.broadcast %161 : vector<16x1xf32> to vector<16x32xf32>
    %163 = arith.subf %153, %162 : vector<16x32xf32>
    %164 = arith.mulf %163, %163 : vector<16x32xf32>
    %cst_68 = arith.constant dense<0.000000e+00> : vector<16xf32>
    %165 = vector.multi_reduction <add>, %164, %cst_68 [1] : vector<16x32xf32> to vector<16xf32>
    %166 = vector.shape_cast %165 : vector<16xf32> to vector<16x1xf32>
    %cst_69 = arith.constant 3.200000e+01 : f32
    %167 = vector.broadcast %cst_69 : f32 to vector<16x1xf32>
    %168 = arith.divf %166, %167 : vector<16x1xf32>
    %cst_70 = arith.constant 9.99999996E-13 : f32
    %169 = vector.broadcast %cst_70 : f32 to vector<16x1xf32>
    %170 = arith.addf %168, %169 : vector<16x1xf32>
    %171 = math.rsqrt %170 : vector<16x1xf32>
    %172 = vector.broadcast %171 : vector<16x1xf32> to vector<16x32xf32>
    %173 = arith.mulf %163, %172 : vector<16x32xf32>
    %174 = vector.broadcast %155 : vector<1x32xf32> to vector<16x32xf32>
    %175 = arith.mulf %173, %174 : vector<16x32xf32>
    %176 = vector.broadcast %157 : vector<1x32xf32> to vector<16x32xf32>
    %177 = arith.addf %175, %176 : vector<16x32xf32>
    %c0_71 = arith.constant 0 : index
    %c0_72 = arith.constant 0 : index
    %178 = vector.load %arg21[%c0_71, %c0_72] : memref<16x32xf32, #tpu.memory_space<vmem>>, vector<16x32xf32>
    tpu.vector_store %arg21[%c0_71, %c0_72], %177 {strides = array<i32>} : memref<16x32xf32, #tpu.memory_space<vmem>>, vector<16x32xf32>,
    %c1_i32 = arith.constant 1 : i32
    %179 = arith.cmpi eq, %arg0, %c1_i32 : i32
    %180 = arith.extui %179 : i1 to i32
    %c0_i32_73 = arith.constant 0 : i32
    %181 = arith.cmpi ne, %180, %c0_i32_73 : i32
    scf.if %181 {
      %182 = vector.extract_strided_slice %177 {offsets = [0, 0], sizes = [1, 32], strides = [1, 1]} : vector<16x32xf32> to vector<1x32xf32>
      %183 = vector.extract_strided_slice %177 {offsets = [8, 0], sizes = [1, 32], strides = [1, 1]} : vector<16x32xf32> to vector<1x32xf32>
      %184 = tpu.concatenate %182, %183 in 0 : vector<1x32xf32>, vector<1x32xf32> -> vector<2x32xf32>
      %185 = arith.truncf %184 : vector<2x32xf32> to vector<2x32xbf16>
      %c0_74 = arith.constant 0 : index
      %c0_75 = arith.constant 0 : index
      %186 = vector.load %arg16[%c0_74, %c0_75] : memref<32x32xbf16, #tpu.memory_space<vmem>>, vector<32x32xbf16>
      %cst_76 = arith.constant dense<0.000000e+00> : vector<2x32xf32>
      %187 = tpu.matmul %185, %186, %cst_76 {dimension_numbers = #tpu.dot_dimension_numbers<[1], [0], [0], [1], [0, 0, 1, 1], [], []>} : vector<2x32xbf16>, vector<32x32xbf16>, vector<2x32xf32> -> vector<2x32xf32>
      %c0_77 = arith.constant 0 : index
      %c0_78 = arith.constant 0 : index
      %188 = vector.load %arg17[%c0_77, %c0_78] : memref<1x32xf32, #tpu.memory_space<vmem>>, vector<1x32xf32>
      %189 = vector.broadcast %188 : vector<1x32xf32> to vector<2x32xf32>
      %190 = arith.addf %187, %189 : vector<2x32xf32>
      %191 = math.tanh %190 : vector<2x32xf32>
      %192 = arith.truncf %191 : vector<2x32xf32> to vector<2x32xbf16>
      %c0_79 = arith.constant 0 : index
      %c0_80 = arith.constant 0 : index
      %193 = vector.load %arg18[%c0_79, %c0_80] : memref<32x2xbf16, #tpu.memory_space<vmem>>, vector<32x2xbf16>
      %cst_81 = arith.constant dense<0.000000e+00> : vector<2x2xf32>
      %194 = tpu.matmul %192, %193, %cst_81 {dimension_numbers = #tpu.dot_dimension_numbers<[1], [0], [0], [1], [0, 0, 1, 1], [], []>} : vector<2x32xbf16>, vector<32x2xbf16>, vector<2x2xf32> -> vector<2x2xf32>
      %c0_82 = arith.constant 0 : index
      %c0_83 = arith.constant 0 : index
      %195 = vector.load %arg19[%c0_82, %c0_83] : memref<1x2xf32, #tpu.memory_space<vmem>>, vector<1x2xf32>
      %196 = vector.broadcast %195 : vector<1x2xf32> to vector<2x2xf32>
      %197 = arith.addf %194, %196 : vector<2x2xf32>
      %c0_84 = arith.constant 0 : index
      %c0_85 = arith.constant 0 : index
      %198 = vector.load %arg20[%c0_84, %c0_85] : memref<2x2xf32, #tpu.memory_space<vmem>>, vector<2x2xf32>
      tpu.vector_store %arg20[%c0_84, %c0_85], %197 {strides = array<i32>} : memref<2x2xf32, #tpu.memory_space<vmem>>, vector<2x2xf32>,
    } else {
    }
    return
  }
  func.func @transform_0(%arg0: i32) -> (i32, i32) {
    %c0_i32 = arith.constant 0 : i32
    %c0_i32_0 = arith.constant 0 : i32
    %c0_i32_1 = arith.constant 0 : i32
    return %c0_i32, %c0_i32_0 : i32, i32
  }
  func.func @transform_1(%arg0: i32) -> (i32, i32) {
    %c0_i32 = arith.constant 0 : i32
    %c0_i32_0 = arith.constant 0 : i32
    %c0_i32_1 = arith.constant 0 : i32
    return %c0_i32, %c0_i32_0 : i32, i32
  }
  func.func @transform_2(%arg0: i32) -> (i32, i32) {
    %c0_i32 = arith.constant 0 : i32
    %c0_i32_0 = arith.constant 0 : i32
    %c0_i32_1 = arith.constant 0 : i32
    return %c0_i32, %c0_i32_0 : i32, i32
  }
  func.func @transform_3(%arg0: i32) -> (i32, i32, i32) {
    %c0_i32 = arith.constant 0 : i32
    %c0_i32_0 = arith.constant 0 : i32
    %c0_i32_1 = arith.constant 0 : i32
    return %arg0, %c0_i32, %c0_i32_0 : i32, i32, i32
  }
  func.func @transform_4(%arg0: i32) -> (i32, i32, i32) {
    %c0_i32 = arith.constant 0 : i32
    %c0_i32_0 = arith.constant 0 : i32
    %c0_i32_1 = arith.constant 0 : i32
    return %arg0, %c0_i32, %c0_i32_0 : i32, i32, i32
  }
  func.func @transform_5(%arg0: i32) -> (i32, i32, i32) {
    %c0_i32 = arith.constant 0 : i32
    %c0_i32_0 = arith.constant 0 : i32
    %c0_i32_1 = arith.constant 0 : i32
    return %arg0, %c0_i32, %c0_i32_0 : i32, i32, i32
  }
  func.func @transform_6(%arg0: i32) -> (i32, i32, i32) {
    %c0_i32 = arith.constant 0 : i32
    %c0_i32_0 = arith.constant 0 : i32
    %c0_i32_1 = arith.constant 0 : i32
    return %arg0, %c0_i32, %c0_i32_0 : i32, i32, i32
  }
  func.func @transform_7(%arg0: i32) -> (i32, i32, i32) {
    %c0_i32 = arith.constant 0 : i32
    %c0_i32_0 = arith.constant 0 : i32
    %c0_i32_1 = arith.constant 0 : i32
    return %arg0, %c0_i32, %c0_i32_0 : i32, i32, i32
  }
  func.func @transform_8(%arg0: i32) -> (i32, i32, i32) {
    %c0_i32 = arith.constant 0 : i32
    %c0_i32_0 = arith.constant 0 : i32
    %c0_i32_1 = arith.constant 0 : i32
    return %arg0, %c0_i32, %c0_i32_0 : i32, i32, i32
  }
  func.func @transform_9(%arg0: i32) -> (i32, i32, i32) {
    %c0_i32 = arith.constant 0 : i32
    %c0_i32_0 = arith.constant 0 : i32
    %c0_i32_1 = arith.constant 0 : i32
    return %arg0, %c0_i32, %c0_i32_0 : i32, i32, i32
  }
  func.func @transform_10(%arg0: i32) -> (i32, i32, i32) {
    %c0_i32 = arith.constant 0 : i32
    %c0_i32_0 = arith.constant 0 : i32
    %c0_i32_1 = arith.constant 0 : i32
    return %arg0, %c0_i32, %c0_i32_0 : i32, i32, i32
  }
  func.func @transform_11(%arg0: i32) -> (i32, i32, i32) {
    %c0_i32 = arith.constant 0 : i32
    %c0_i32_0 = arith.constant 0 : i32
    %c0_i32_1 = arith.constant 0 : i32
    return %arg0, %c0_i32, %c0_i32_0 : i32, i32, i32
  }
  func.func @transform_12(%arg0: i32) -> (i32, i32, i32) {
    %c0_i32 = arith.constant 0 : i32
    %c0_i32_0 = arith.constant 0 : i32
    %c0_i32_1 = arith.constant 0 : i32
    return %arg0, %c0_i32, %c0_i32_0 : i32, i32, i32
  }
  func.func @transform_13(%arg0: i32) -> (i32, i32, i32) {
    %c0_i32 = arith.constant 0 : i32
    %c0_i32_0 = arith.constant 0 : i32
    %c0_i32_1 = arith.constant 0 : i32
    return %arg0, %c0_i32, %c0_i32_0 : i32, i32, i32
  }
  func.func @transform_14(%arg0: i32) -> (i32, i32, i32) {
    %c0_i32 = arith.constant 0 : i32
    %c0_i32_0 = arith.constant 0 : i32
    %c0_i32_1 = arith.constant 0 : i32
    return %arg0, %c0_i32, %c0_i32_0 : i32, i32, i32
  }
  func.func @transform_15(%arg0: i32) -> (i32, i32) {
    %c0_i32 = arith.constant 0 : i32
    %c0_i32_0 = arith.constant 0 : i32
    %c0_i32_1 = arith.constant 0 : i32
    return %c0_i32, %c0_i32_0 : i32, i32
  }
  func.func @transform_16(%arg0: i32) -> (i32, i32) {
    %c0_i32 = arith.constant 0 : i32
    %c0_i32_0 = arith.constant 0 : i32
    %c0_i32_1 = arith.constant 0 : i32
    return %c0_i32, %c0_i32_0 : i32, i32
  }
  func.func @transform_17(%arg0: i32) -> (i32, i32) {
    %c0_i32 = arith.constant 0 : i32
    %c0_i32_0 = arith.constant 0 : i32
    %c0_i32_1 = arith.constant 0 : i32
    return %c0_i32, %c0_i32_0 : i32, i32
  }
  func.func @transform_18(%arg0: i32) -> (i32, i32) {
    %c0_i32 = arith.constant 0 : i32
    %c0_i32_0 = arith.constant 0 : i32
    %c0_i32_1 = arith.constant 0 : i32
    return %c0_i32, %c0_i32_0 : i32, i32
  }
  func.func @transform_19(%arg0: i32) -> (i32, i32) {
    %c0_i32 = arith.constant 0 : i32
    %c0_i32_0 = arith.constant 0 : i32
    %c0_i32_1 = arith.constant 0 : i32
    return %c0_i32, %c0_i32_0 : i32, i32
  }
}

</mosaic_0001>

<bundles_post_ra>
// kernel: bert_forward.1
= control target key start
LH: loop header
LB: loop body
LE: loop exit
PB: predicated region body
PF: predicated region fallthrough
CT: control target
= control target key end

     0   :  { %s2609_s0 = inlined_call_operand.vmem [shape: f32[16,32], index: 0, kind: input, shape index: {}]   ;;  %s2610_s1 = inlined_call_operand.vmem [shape: f32[1,32], index: 1, kind: input, shape index: {}]   ;;  %s2611_s2 = inlined_call_operand.vmem [shape: f32[1,32], index: 2, kind: input, shape index: {}]   ;;  %s2612_s3 = inlined_call_operand.vmem [shape: bf16[2,32,96], index: 3, kind: input, shape index: {}]   ;;  %s2613_s4 = inlined_call_operand.vmem [shape: f32[2,1,96], index: 4, kind: input, shape index: {}]   ;;  %s2614_s5 = inlined_call_operand.vmem [shape: bf16[2,32,32], index: 5, kind: input, shape index: {}]   ;;  %s2615_s6 = inlined_call_operand.vmem [shape: f32[2,1,32], index: 6, kind: input, shape index: {}]   ;;  %s2616_s7 = inlined_call_operand.vmem [shape: f32[2,1,32], index: 7, kind: input, shape index: {}]   ;;  %s2617_s8 = inlined_call_operand.vmem [shape: f32[2,1,32], index: 8, kind: input, shape index: {}]   ;;  %s2618_s9 = inlined_call_operand.vmem [shape: bf16[2,32,64], index: 9, kind: input, shape index: {}]   ;;  %s2619_s10 = inlined_call_operand.vmem [shape: f32[2,1,64], index: 10, kind: input, shape index: {}]   ;;  %s2620_s11 = inlined_call_operand.vmem [shape: bf16[2,64,32], index: 11, kind: input, shape index: {}]   ;;  %s2621_s12 = inlined_call_operand.vmem [shape: f32[2,1,32], index: 12, kind: input, shape index: {}]   ;;  %s2622_s13 = inlined_call_operand.vmem [shape: f32[2,1,32], index: 13, kind: input, shape index: {}]   ;;  %s2623_s14 = inlined_call_operand.vmem [shape: f32[2,1,32], index: 14, kind: input, shape index: {}]   ;;  %s2624_s15 = inlined_call_operand.vmem [shape: bf16[32,32], index: 15, kind: input, shape index: {}]   ;;  %s2625_s16 = inlined_call_operand.vmem [shape: f32[1,32], index: 16, kind: input, shape index: {}]   ;;  %s2626_s17 = inlined_call_operand.vmem [shape: bf16[32,2], index: 17, kind: input, shape index: {}]   ;;  %s2627_s18 = inlined_call_operand.vmem [shape: f32[1,2], index: 18, kind: input, shape index: {}]   ;;  %s2628_s19 = inlined_call_operand.vmem [shape: f32[2,2], index: 19, kind: output, shape index: {}]  }
   0x1   :  { %2633 = sst [smem:[#allocation4_spill]] %s2609_s0  ;;  %s2340_s0 = smov 0  }
   0x2   :  { %2634 = sst [smem:[#allocation5_spill]] %s2610_s1 }
   0x3   :  { %2635 = sst [smem:[#allocation6_spill]] %s2611_s2 }
   0x4   :  { %2636 = sst [smem:[#allocation7_spill]] %s2612_s3 }
   0x5   :  { %2637 = sst [smem:[#allocation8_spill]] %s2614_s5 }
   0x6   :  { %2638 = sst [smem:[#allocation9_spill]] %s2624_s15 }
   0x7   :  { %2639 = sst [smem:[#allocation10_spill]] %s2625_s16 }
   0x8   :  { %2640 = sst [smem:[#allocation11_spill]] %s2626_s17 }
   0x9   :  { %2641 = sst [smem:[#allocation12_spill]] %s2627_s18 }
   0xa   :  { %2642 = sst [smem:[#allocation13_spill]] %s2628_s19 }
   0xb LB: > { %2643 = sst [smem:[#allocation3_spill]] %s2228_s0  ;;  %s2346_s30 = sadd.s32 4294967295, %s2228_s0   ;;  %s2228_s0 = sphi %s2340_s0, %s29_s0  }
   0xc   : > { %p1958_p0 = scmp.ge.s32.totalorder %s2228_s0, 1  ;;  %p626_p1 = scmp.lt.s32.totalorder %s2228_s0, 3 }
   0xe   : > { %p627_p2 = pnand %p1958_p0, %p626_p1 }
   0xf   : > { %p716_p3 = scmp.lt.s32.totalorder (!%p627_p2), %s2346_s30, 1  ;;  %s2644_s25 = sld [smem:[#allocation7_spill]] (!%p627_p2) }
  0x10   : > { %630 = sbr.rel (%p627_p2) target bundleno = 3227 (0xc9b), region = 96  ;;  %s2645_s5 = sld [smem:[#allocation8_spill]] (!%p627_p2) }
  0x11   : > { %p1967_p4 = scmp.ne.s32.totalorder (!%p627_p2), %s2346_s30, 0 }
  0x15   : > { %s2352_s20 = scalar_select %p716_p3, %s2346_s30, 1 }
  0x16   : > { %s2646_s0 = sld [smem:[#allocation4_spill]] (!%p1967_p4) }
  0x17   : > { %s2011_s21 = sshll.u32 %s2352_s20, 4  ;;  %s2014_s15 = sshll.u32 %s2352_s20, 5 }
  0x18   : > { %s2362_s3 = scalar_lea.vmem %s2644_s25, %s2011_s21  ;;  %s2367_s28 = scalar_lea.vmem %s2645_s5, %s2011_s21 }
  0x19   : > { %s2384_s25 = scalar_lea.vmem %s2618_s9, %s2011_s21  ;;  %s2394_s19 = scalar_lea.vmem %s2620_s11, %s2014_s15 }
  0x1a   : > { %s753_s1 = scalar_lea.vmem %s2621_s12, %s2352_s20  ;;  %s756_s23 = scalar_lea.vmem %s2622_s13, %s2352_s20 }
  0x1b   : > { %s759_s17 = scalar_lea.vmem %s2623_s14, %s2352_s20  ;;  %764 = sbr.rel (%p1967_p4) target bundleno = 346 (0x15a), region = 100 }
  0x1c   : > { %s2647_s29 = smov (!%p1967_p4), %s2646_s0  ;;  %s2648_s16 = sld [smem:[#allocation5_spill]] (!%p1967_p4) }
  0x1d   : > { %s2649_s21 = sld [smem:[#allocation6_spill]] (!%p1967_p4) }
  0x20   : > { %v765_v0 = vld [vmem:[%s2646_s0] sm:$0xff]  ;;  %vm769_vm0 = vcmask 261120   ;;  %v766_v1 = vld [vmem:[%s2647_s29 + $0x8] sm:$0xff] }
  0x21   : > { %v770_v2 = vsel %vm769_vm0, %v765_v0, 0.0  ;;  %v773_v3 = vsel %vm769_vm0, %v766_v1, 0.0 }
  0x22   : > { %771 = vadd.xlane.f32.xlu0 %v770_v2  ;;  %v1968_v21 = vld [vmem:[%s2648_s16] ss:$0 sm:$0xff] }
  0x23   : > { %v1969_v23 = vld [vmem:[%s2649_s21] ss:$0 sm:$0xff] }
  0x26   : > { %774 = vadd.xlane.f32.xlu0 %v773_v3 }
  0xab   : > { %v772_v4 = vpop.xlane.xlu0 %771 }
  0xac   : > { %v777_v5 = vmul.f32 0.03125, %v772_v4 }
  0xae   : > { %v779_v6 = vsub.f32 %v765_v0, %v777_v5 }
  0xaf   : > { %v775_v7 = vpop.xlane.xlu0 %774 }
  0xb0   : > { %v778_v8 = vmul.f32 0.03125, %v775_v7  ;;  %v781_v9 = vmul.f32 %v779_v6, %v779_v6 }
  0xb2   : > { %v780_v10 = vsub.f32 %v766_v1, %v778_v8  ;;  %v783_v11 = vsel %vm769_vm0, %v781_v9, 0.0 }
  0xb3   : > { %784 = vadd.xlane.f32.xlu1 %v783_v11 }
  0xb4   : > { %v782_v12 = vmul.f32 %v780_v10, %v780_v10 }
  0xb6   : > { %v786_v13 = vsel %vm769_vm0, %v782_v12, 0.0 }
  0xb7   : > { %787 = vadd.xlane.f32.xlu1 %v786_v13 }
 0x13c   : > { %v785_v14 = vpop.xlane.xlu1 %784 }
 0x13d   : > { %v789_v15 = vmul.f32 0.03125, %v785_v14 }
 0x13f   : > { %v791_v16 = vadd.f32 1e-12, %v789_v15 }
 0x140   : > { %v788_v17 = vpop.xlane.xlu1 %787 }
 0x141   : > { %2169 = vrsqrt.f32 %v791_v16  ;;  %v790_v18 = vmul.f32 0.03125, %v788_v17 }
 0x143   : > { %v792_v19 = vadd.f32 1e-12, %v790_v18 }
 0x145   : > { %2171 = vrsqrt.f32 %v792_v19 }
 0x14e   : > { %v2170_v20 = vpop.eup %2169 }
 0x14f   : > { %v795_v22 = vmul.f32 %v2170_v20, %v779_v6 }
 0x151   : > { %v803_v24 = vmul.f32 %v1968_v21, %v795_v22 }
 0x152   : > { %v2172_v25 = vpop.eup %2171 }
 0x153   : > { %v811_v26 = vadd.f32 %v1969_v23, %v803_v24  ;;  %v796_v27 = vmul.f32 %v2172_v25, %v780_v10 }
 0x155   : > { %813 = vst.msk [vmem:[#allocation2] sm:$0xff] %vm769_vm0, %v811_v26  ;;  %v804_v28 = vmul.f32 %v1968_v21, %v796_v27 }
 0x157   : > { %v812_v29 = vadd.f32 %v1969_v23, %v804_v28 }
 0x159   : > { %814 = vst.msk [vmem:[#allocation2 + $0x8] sm:$0xff] %vm769_vm0, %v812_v29 }
 0x15a PF: > { %v2178_v30 = vld [vmem:[%s2362_s3 + $0x8] sm:$0xff]   ;;  %v2230_v31 = vmov 0.0   ;;  %v2179_v32 = vld [vmem:[%s2362_s3] sm:$0xff]   ;;  %vm2231_vm1 = vmmov 0   ;;  %vm841_vm2 = vcmask 261120   ;;  %s2650_s26 = scalar_lea.vmem %s2613_s4, %s2352_s20  ;;  %s2232_s27 = smov 112  }
 0x15b   : > { %2051 = vmatprep.subr.bf16.mxu0 %v2230_v31  ;;  %2059 = vmatprep.subr.bf16.mxu1 %v2230_v31  ;;  %v1970_v36 = vld [vmem:[%s2650_s26] ss:$0 sm:$0xff]  ;;  %s2233_s0 = smov 96   ;;  %s2234_s15 = smov 80   ;;  %vm890_vm3 = vcmask 130048   ;;  %vm937_vm4 = vcmask 64512  }
 0x15c   : > { %2052 = vmatpush3.bf16.msra.mxu0 %v2178_v30  ;;  %2055 = vmatprep.mubr.msk.bf16.mxu0 %vm2231_vm1, %v2230_v31  ;;  %v2433_v33 = vld [vmem:[#allocation2] sm:$0xff]  ;;  %s2235_s5 = smov 64   ;;  %s2236_s2 = smov 48   ;;  %vm955_vm5 = vcmask 1043456   ;;  %vm1580_vm6 = vcmask 523264  }
 0x15d   : > { %2053 = vmatprep.subr.bf16.mxu0 %v2230_v31  ;;  %2061 = vmatprep.mubr.msk.bf16.mxu1 %vm2231_vm1, %v2230_v31  ;;  %s2237_s16 = smov 16   ;;  %s2651_s22 = scalar_lea.vmem %s2615_s6, %s2352_s20 }
 0x15e   : > { %p2000_p5 = scmp.ne.s32.totalorder %s2346_s30, 1 }
 0x15f   : > { %s2655_s21 = sld [smem:[#allocation9_spill]] (!%p2000_p5) }
 0x160   : > { %v2435_v34 = vld [vmem:[#allocation2 + $0x8] sm:$0xff]  ;;  %2054 = vmatpush3.bf16.msra.mxu0 %v2179_v32 }
 0x161   : > { %v817_v35 = vpack.c.bf16 %v2435_v34, %v2433_v33  ;;  %2065 = vmatprep.subr.bf16.mxu0 %v2230_v31 }
 0x163   : > { %2056 = vmatmul.mubr.msk.bf16.vlgmr.msra.gmra.mxu0 %vm841_vm2, %v817_v35 }
 0x164   : > { %2067 = vmatprep.mubr.msk.bf16.mxu0 %vm2231_vm1, %v2230_v31 }
 0x223   : > { %v879_v37 = vpop.f32.mrf.mxu0 }
 0x224   : > { %v880_v38 = vadd.f32 %v1970_v36, %v879_v37 }
 0x225   : > { %v2057_v39 = vpop.f32.mrf.mxu0 }
 0x226   : > { %v2451_v40 = vpack.c.bf16 %v880_v38, %v880_v38 }
 0x227   : > { %v882_v41 = vpop.f32.mrf.mxu0 }
 0x228   : > { %v883_v42 = vadd.f32 %v1970_v36, %v882_v41  ;;  %999 = vrot.lane.b32.xlu1 %v2451_v40, %s2232_s27  ;;  %888 = vrot.lane.b32.xlu0 %v2451_v40, %s2233_s0 }
 0x229   : > { %v2058_v43 = vpop.f32.mrf.mxu0 }
 0x22a   : > { %v2455_v44 = vpack.c.bf16 %v883_v42, %v883_v42 }
 0x22c   : > { %1001 = vrot.lane.b32.xlu0 %v2451_v40, %s2234_s15  ;;  %1116 = vrot.lane.b32.xlu1 %v2455_v44, %s2233_s0 }
 0x230   : > { %1226 = vrot.lane.b32.xlu0 %v2455_v44, %s2234_s15  ;;  %1224 = vrot.lane.b32.xlu1 %v2455_v44, %s2232_s27  ;;  %s2653_s27 = scalar_lea.vmem %s2617_s8, %s2352_s20  ;;  %s2657_s15 = sld [smem:[#allocation10_spill]] (!%p2000_p5) }
 0x29a   : > { %v889_v45 = vpop.permute.xlu0 %888  ;;  %v1000_v48 = vpop.permute.xlu1 %999 }
 0x29b   : > { %v895_v46 = vsel %vm890_vm3, %v889_v45, 0 }
 0x29c   : > { %2060 = vmatpush3.bf16.xpose.msra.mxu1 %v895_v46 }
 0x29d   : > { %2071 = vmatprep.subr.bf16.mxu1 %v2230_v31 }
 0x29e   : > { %v1002_v47 = vpop.permute.xlu0 %1001  ;;  %v1117_v50 = vpop.permute.xlu1 %1116 }
 0x29f   : > { %v1007_v49 = vsel %vm890_vm3, %v1002_v47, 0  ;;  %v1122_v51 = vsel %vm890_vm3, %v1117_v50, 0 }
 0x2a2   : > { %v1227_v52 = vpop.permute.xlu0 %1226  ;;  %v1225_v54 = vpop.permute.xlu1 %1224 }
 0x2a3   : > { %2062 = vmatmul.mubr.msk.bf16.vlgmr.msra.gmra.mxu1 %vm890_vm3, %v2451_v40  ;;  %v1232_v53 = vsel %vm890_vm3, %v1227_v52, 0 }
 0x2a4   : > { %2072 = vmatpush3.bf16.xpose.msra.mxu1 %v1007_v49  ;;  %2073 = vmatprep.mubr.msk.bf16.mxu1 %vm2231_vm1, %v2230_v31 }
 0x2a5   : > { %2083 = vmatprep.subr.bf16.mxu1 %v2230_v31 }
 0x2ab   : > { %2074 = vmatmul.mubr.msk.bf16.vlgmr.msra.gmra.mxu1 %vm890_vm3, %v1000_v48 }
 0x2ac   : > { %2084 = vmatpush3.bf16.xpose.msra.mxu1 %v1122_v51  ;;  %2085 = vmatprep.mubr.msk.bf16.mxu1 %vm2231_vm1, %v2230_v31 }
 0x2ad   : > { %2095 = vmatprep.subr.bf16.mxu1 %v2230_v31 }
 0x2b3   : > { %2086 = vmatmul.mubr.msk.bf16.vlgmr.msra.gmra.mxu1 %vm890_vm3, %v2455_v44 }
 0x2b4   : > { %2096 = vmatpush3.bf16.xpose.msra.mxu1 %v1232_v53  ;;  %2097 = vmatprep.mubr.msk.bf16.mxu1 %vm2231_vm1, %v2230_v31 }
 0x2b5   : > { %2107 = vmatprep.subr.bf16.mxu1 %v2230_v31 }
 0x2bb   : > { %2098 = vmatmul.mubr.msk.bf16.vlgmr.msra.gmra.mxu1 %vm890_vm3, %v1225_v54 }
 0x2bc   : > { %2111 = vmatprep.mubr.msk.bf16.mxu1 %vm2231_vm1, %v2230_v31 }
 0x363   : > { %v931_v55 = vpop.f32.mrf.mxu1 }
 0x364   : > { %v938_v56 = vsel %vm937_vm4, %v931_v55, -inf }
 0x365   : > { %v2063_v57 = vpop.f32.mrf.mxu1  ;;  %939 = vmax.xlane.f32.xlu0 %v938_v56 }
 0x367   : > { %v934_v58 = vpop.f32.mrf.mxu1 }
 0x368   : > { %v2180_v58 = vld [vmem:[%s2367_s28 + $0x8] sm:$0xff]  }
 0x369   : > { %v2064_v59 = vpop.f32.mrf.mxu1  ;;  %2108 = vmatpush3.bf16.msra.mxu1 %v2180_v58 }
 0x36a   : > { %2109 = vmatprep.subr.bf16.mxu1 %v2230_v31 }
 0x36b   : > { %v1043_v60 = vpop.f32.mrf.mxu1 }
 0x36c   : > { %v1049_v61 = vsel %vm937_vm4, %v1043_v60, -inf }
 0x36d   : > { %v2075_v62 = vpop.f32.mrf.mxu1  ;;  %1050 = vmax.xlane.f32.xlu1 %v1049_v61 }
 0x36f   : > { %v1046_v63 = vpop.f32.mrf.mxu1 }
 0x371   : > { %v2076_v0 = vpop.f32.mrf.mxu1 }
 0x373   : > { %v1158_v1 = vpop.f32.mrf.mxu1 }
 0x374   : > { %v1164_v2 = vsel %vm937_vm4, %v1158_v1, -inf }
 0x375   : > { %1165 = vmax.xlane.f32.xlu0 %v1164_v2  ;;  %v2087_v3 = vpop.f32.mrf.mxu1 }
 0x376   : > { %v2181_v3 = vld [vmem:[%s2367_s28] sm:$0xff]   ;;  %s2659_s28 = sld [smem:[#allocation13_spill]] (!%p2000_p5) }
 0x377   : > { %v1161_v4 = vpop.f32.mrf.mxu1  ;;  %2110 = vmatpush3.bf16.msra.mxu1 %v2181_v3 }
 0x378   : > { %2123 = vmatprep.subr.bf16.mxu1 %v2230_v31 }
 0x379   : > { %v2088_v5 = vpop.f32.mrf.mxu1 }
 0x37b   : > { %v1268_v6 = vpop.f32.mrf.mxu1 }
 0x37c   : > { %v1274_v7 = vsel %vm937_vm4, %v1268_v6, -inf }
 0x37d   : > { %1275 = vmax.xlane.f32.xlu0 %v1274_v7  ;;  %v2099_v8 = vpop.f32.mrf.mxu1 }
 0x37f   : > { %v1271_v9 = vpop.f32.mrf.mxu1 }
 0x381   : > { %v2100_v10 = vpop.f32.mrf.mxu1 }
 0x3ee   : > { %v940_v11 = vpop.xlane.xlu0 %939 }
 0x3ef   : > { %v941_v12 = vsub.f32 %v931_v55, %v940_v11 }
 0x3f1   : > { %v942_v13 = vmul.f32 1.442695, %v941_v12 }
 0x3f3   : > { %2188 = vpow2.f32 %v942_v13 }
 0x3f6   : > { %v1051_v14 = vpop.xlane.xlu1 %1050 }
 0x3f7   : > { %v1052_v15 = vsub.f32 %v1043_v60, %v1051_v14 }
 0x3f9   : > { %v1053_v16 = vmul.f32 1.442695, %v1052_v15 }
 0x3fb   : > { %2190 = vpow2.f32 %v1053_v16 }
 0x3fe   : > { %v1166_v19 = vpop.xlane.xlu0 %1165 }
 0x3ff   : > { %v1167_v27 = vsub.f32 %v1158_v1, %v1166_v19  ;;  %v1982_v19 = vld [vmem:[%s2651_s22] ss:$0 sm:$0xff] }
 0x400   : > { %v2189_v17 = vpop.eup %2188 }
 0x401   : > { %v944_v18 = vsel %vm937_vm4, %v2189_v17, 0.0  ;;  %v1168_v28 = vmul.f32 1.442695, %v1167_v27 }
 0x402   : > { %945 = vadd.xlane.f32.xlu1 %v944_v18 }
 0x406   : > { %v1276_v20 = vpop.xlane.xlu0 %1275 }
 0x407   : > { %v1277_v21 = vsub.f32 %v1268_v6, %v1276_v20 }
 0x408   : > { %v2191_v22 = vpop.eup %2190 }
 0x409   : > { %v1278_v23 = vmul.f32 1.442695, %v1277_v21  ;;  %v1055_v24 = vsel %vm937_vm4, %v2191_v22, 0.0 }
 0x40a   : > { %1056 = vadd.xlane.f32.xlu0 %v1055_v24 }
 0x40b   : > { %2192 = vpow2.f32 %v1278_v23 }
 0x40c   : > { %2194 = vpow2.f32 %v1168_v28 }
 0x413   : > { %950 = vrot.lane.b32.xlu1 %v2451_v40, %s2235_s5 }
 0x418   : > { %v2193_v25 = vpop.eup %2192 }
 0x419   : > { %v1280_v26 = vsel %vm937_vm4, %v2193_v25, 0.0  ;;  %v2195_v29 = vpop.eup %2194 }
 0x41a   : > { %1281 = vadd.xlane.f32.xlu0 %v1280_v26  ;;  %v1170_v30 = vsel %vm937_vm4, %v2195_v29, 0.0 }
 0x430   : > { %1061 = vrot.lane.b32.xlu0 %v2451_v40, %s2236_s2 }
 0x437   : > { %1171 = vadd.xlane.f32.xlu1 %v1170_v30 }
 0x448   : > { %1176 = vrot.lane.b32.xlu1 %v2455_v44, %s2235_s5  ;;  %s2654_s5 = scalar_lea.vmem %s2619_s10, %s2352_s20 }
 0x44c   : > { %1286 = vrot.lane.b32.xlu1 %v2455_v44, %s2236_s2  ;;  %s2658_s2 = sld [smem:[#allocation12_spill]] (!%p2000_p5) }
 0x48b   : > { %v946_v32 = vpop.xlane.xlu1 %945 }
 0x48c   : > { %2196 = vrcp.f32 %v946_v32 }
 0x48f   : > { %v951_v35 = vpop.permute.xlu1 %950 }
 0x490   : > { %v957_v36 = vsel %vm955_vm5, %v951_v35, 0 }
 0x491   : > { %2066 = vmatpush3.bf16.msra.mxu0 %v957_v36 }
 0x492   : > { %2077 = vmatprep.subr.bf16.mxu0 %v2230_v31 }
 0x493   : > { %v1057_v37 = vpop.xlane.xlu0 %1056 }
 0x494   : > { %2198 = vrcp.f32 %v1057_v37 }
 0x499   : > { %v2197_v38 = vpop.eup %2196 }
 0x49a   : > { %v948_v39 = vmul.f32 %v2197_v38, %v2189_v17 }
 0x49c   : > { %v949_v40 = vpack.c.bf16 %v948_v39, %v948_v39 }
 0x49e   : > { %2068 = vmatmul.mubr.msk.bf16.vlgmr.msra.gmra.mxu0 %vm937_vm4, %v949_v40 }
 0x49f   : > { %2079 = vmatprep.mubr.msk.bf16.mxu0 %vm2231_vm1, %v2230_v31 }
 0x4a1   : > { %v2199_v41 = vpop.eup %2198 }
 0x4a2   : > { %v1059_v43 = vmul.f32 %v2199_v41, %v2191_v22 }
 0x4a3   : > { %v1282_v42 = vpop.xlane.xlu0 %1281 }
 0x4a4   : > { %v1060_v46 = vpack.c.bf16 %v1059_v43, %v1059_v43 }
 0x4a7   : > { %v1062_v44 = vpop.permute.xlu0 %1061 }
 0x4a8   : > { %v1067_v45 = vsel %vm955_vm5, %v1062_v44, 0 }
 0x4a9   : > { %2078 = vmatpush3.bf16.msra.mxu0 %v1067_v45 }
 0x4aa   : > { %2089 = vmatprep.subr.bf16.mxu0 %v2230_v31 }
 0x4ac   : > { %2080 = vmatmul.mubr.msk.bf16.vlgmr.msra.gmra.mxu0 %vm937_vm4, %v1060_v46 }
 0x4ad   : > { %2091 = vmatprep.mubr.msk.bf16.mxu0 %vm2231_vm1, %v2230_v31 }
 0x4c0   : > { %v1172_v47 = vpop.xlane.xlu1 %1171 }
 0x4c1   : > { %2200 = vrcp.f32 %v1172_v47 }
 0x4c2   : > { %2202 = vrcp.f32 %v1282_v42  ;;  %v2183_v42 = vld [vmem:[%s2384_s25] sm:$0xff]  }
 0x4c4   : > { %v1177_v48 = vpop.permute.xlu1 %1176 }
 0x4c5   : > { %v1182_v49 = vsel %vm955_vm5, %v1177_v48, 0 }
 0x4c6   : > { %2090 = vmatpush3.bf16.msra.mxu0 %v1182_v49 }
 0x4c7   : > { %2101 = vmatprep.subr.bf16.mxu0 %v2230_v31 }
 0x4c8   : > { %v1287_v52 = vpop.permute.xlu1 %1286 }
 0x4c9   : > { %v1292_v55 = vsel %vm955_vm5, %v1287_v52, 0 }
 0x4ce   : > { %v2201_v50 = vpop.eup %2200 }
 0x4cf   : > { %v1174_v51 = vmul.f32 %v2201_v50, %v2195_v29  ;;  %v2203_v54 = vpop.eup %2202 }
 0x4d0   : > { %v1284_v56 = vmul.f32 %v2203_v54, %v2193_v25 }
 0x4d1   : > { %v1175_v53 = vpack.c.bf16 %v1174_v51, %v1174_v51 }
 0x4d2   : > { %v1285_v57 = vpack.c.bf16 %v1284_v56, %v1284_v56 }
 0x4d3   : > { %2092 = vmatmul.mubr.msk.bf16.vlgmr.msra.gmra.mxu0 %vm937_vm4, %v1175_v53 }
 0x4d4   : > { %2102 = vmatpush3.bf16.msra.mxu0 %v1292_v55  ;;  %2103 = vmatprep.mubr.msk.bf16.mxu0 %vm2231_vm1, %v2230_v31  ;;  %v1987_v55 = vld [vmem:[%s2653_s27] ss:$0 sm:$0xff] }
 0x4d5   : > { %2115 = vmatprep.subr.bf16.mxu0 %v2230_v31 }
 0x4db   : > { %2104 = vmatmul.mubr.msk.bf16.vlgmr.msra.gmra.mxu0 %vm937_vm4, %v1285_v57 }
 0x4dc   : > { %2119 = vmatprep.mubr.msk.bf16.mxu0 %vm2231_vm1, %v2230_v31 }
 0x55e   : > { %v993_v59 = vpop.f32.mrf.mxu0 }
 0x560   : > { %v2069_v60 = vpop.f32.mrf.mxu0 }
 0x561   : > { %v2184_v60 = vld [vmem:[%s2394_s19 + $0x18] sm:$0xff]  }
 0x562   : > { %v996_v61 = vpop.f32.mrf.mxu0 }
 0x563   : > { %v2185_v61 = vld [vmem:[%s2394_s19 + $0x10] sm:$0xff]  }
 0x564   : > { %v2070_v62 = vpop.f32.mrf.mxu0 }
 0x565   : > { %v2186_v62 = vld [vmem:[%s2394_s19 + $0x8] sm:$0xff]  }
 0x56c   : > { %v1103_v63 = vpop.f32.mrf.mxu0 }
 0x56e   : > { %v2081_v0 = vpop.f32.mrf.mxu0 }
 0x56f   : > { %v1988_v0 = vld [vmem:[%s2654_s5] ss:$0 sm:$0xff] }
 0x570   : > { %v1106_v1 = vpop.f32.mrf.mxu0 }
 0x572   : > { %v2082_v2 = vpop.f32.mrf.mxu0 }
 0x593   : > { %v1218_v4 = vpop.f32.mrf.mxu0 }
 0x595   : > { %v2093_v5 = vpop.f32.mrf.mxu0 }
 0x597   : > { %v1221_v6 = vpop.f32.mrf.mxu0 }
 0x599   : > { %v2094_v7 = vpop.f32.mrf.mxu0 }
 0x59b   : > { %v1328_v8 = vpop.f32.mrf.mxu0 }
 0x59c   : > { %v2173_v9 = vpack.i.bf16 %v1328_v8, %v1103_v63  ;;  %v2187_v63 = vld [vmem:[%s2394_s19] sm:$0xff]  }
 0x59d   : > { %v2105_v10 = vpop.f32.mrf.mxu0 }
 0x59e   : > { %2174 = vrot.lane.b32.xlu0 %v2173_v9, %s2237_s16 }
 0x59f   : > { %v1331_v11 = vpop.f32.mrf.mxu0 }
 0x5a1   : > { %v2106_v12 = vpop.f32.mrf.mxu0 }
 0x610   : > { %v2175_v13 = vpop.permute.xlu0 %2174 }
 0x611   : > { %v2177_v14 = vunpack.i.h.bf16 %v2175_v13  ;;  %v2176_v15 = vunpack.i.l.bf16 %v2175_v13 }
 0x613   : > { %v1338_v16 = vsel %vm890_vm3, %v1218_v4, %v2177_v14  ;;  %v1113_v17 = vsel %vm890_vm3, %v993_v59, %v2176_v15 }
 0x614   : > { %v1339_v18 = vpack.c.bf16 %v1338_v16, %v1113_v17 }
 0x616   : > { %2112 = vmatmul.mubr.msk.bf16.vlgmr.msra.gmra.mxu1 %vm841_vm2, %v1339_v18 }
 0x617   : > { %2131 = vmatprep.mubr.msk.bf16.mxu1 %vm2231_vm1, %v2230_v31  ;;  %2124 = vmatpush3.bf16.msra.mxu1 %v2184_v60 }
 0x618   : > { %2125 = vmatprep.subr.bf16.mxu1 %v2230_v31 }
 0x61b   : > { %2126 = vmatpush3.bf16.msra.mxu1 %v2185_v61 }
 0x61c   : > { %2127 = vmatprep.subr.bf16.mxu1 %v2230_v31 }
 0x61f   : > { %2128 = vmatpush3.bf16.msra.mxu1 %v2186_v62 }
 0x620   : > { %2129 = vmatprep.subr.bf16.mxu1 %v2230_v31 }
 0x623   : > { %2130 = vmatpush3.bf16.msra.mxu1 %v2187_v63 }
 0x6d6   : > { %v1400_v20 = vpop.f32.mrf.mxu1 }
 0x6d7   : > { %v1401_v21 = vadd.f32 %v1982_v19, %v1400_v20 }
 0x6d8   : > { %v2113_v22 = vpop.f32.mrf.mxu1 }
 0x6d9   : > { %v1407_v23 = vadd.f32 %v1401_v21, %v2433_v33 }
 0x6da   : > { %v1403_v24 = vpop.f32.mrf.mxu1 }
 0x6db   : > { %v1404_v25 = vadd.f32 %v1982_v19, %v1403_v24  ;;  %v1411_v26 = vsel %vm841_vm2, %v1407_v23, 0.0 }
 0x6dc   : > { %1412 = vadd.xlane.f32.xlu1 %v1411_v26  ;;  %v2114_v27 = vpop.f32.mrf.mxu1 }
 0x6dd   : > { %v1408_v28 = vadd.f32 %v1404_v25, %v2435_v34  ;;  %v2182_v34 = vld [vmem:[%s2384_s25 + $0x8] sm:$0xff]   ;;  %s2652_s25 = scalar_lea.vmem %s2616_s7, %s2352_s20  ;;  %v1992_v25 = vld [vmem:[%s753_s1] ss:$0 sm:$0xff] }
 0x6de   : > { %2116 = vmatpush3.bf16.msra.mxu0 %v2182_v34  ;;  %v1986_v51 = vld [vmem:[%s2652_s25] ss:$0 sm:$0xff]  ;;  %s2656_s25 = sld [smem:[#allocation11_spill]] (!%p2000_p5) }
 0x6df   : > { %v1414_v29 = vsel %vm841_vm2, %v1408_v28, 0.0  ;;  %2117 = vmatprep.subr.bf16.mxu0 %v2230_v31 }
 0x6e0   : > { %1415 = vadd.xlane.f32.xlu0 %v1414_v29 }
 0x6e2   : > { %2118 = vmatpush3.bf16.msra.mxu0 %v2183_v42 }
 0x765   : > { %v1413_v30 = vpop.xlane.xlu1 %1412 }
 0x766   : > { %v1418_v32 = vmul.f32 0.03125, %v1413_v30 }
 0x768   : > { %v1420_v35 = vsub.f32 %v1407_v23, %v1418_v32 }
 0x769   : > { %v1416_v36 = vpop.xlane.xlu0 %1415 }
 0x76a   : > { %v1419_v37 = vmul.f32 0.03125, %v1416_v36  ;;  %v1422_v38 = vmul.f32 %v1420_v35, %v1420_v35 }
 0x76c   : > { %v1421_v33 = vsub.f32 %v1408_v28, %v1419_v37  ;;  %v1424_v39 = vsel %vm841_vm2, %v1422_v38, 0.0 }
 0x76d   : > { %1425 = vadd.xlane.f32.xlu0 %v1424_v39 }
 0x76e   : > { %v1423_v40 = vmul.f32 %v1421_v33, %v1421_v33 }
 0x770   : > { %v1427_v41 = vsel %vm841_vm2, %v1423_v40, 0.0 }
 0x771   : > { %1428 = vadd.xlane.f32.xlu1 %v1427_v41 }
 0x7f6   : > { %v1426_v43 = vpop.xlane.xlu0 %1425 }
 0x7f7   : > { %v1430_v44 = vmul.f32 0.03125, %v1426_v43 }
 0x7f9   : > { %v1432_v45 = vadd.f32 1e-12, %v1430_v44 }
 0x7fa   : > { %v1429_v46 = vpop.xlane.xlu1 %1428 }
 0x7fb   : > { %2204 = vrsqrt.f32 %v1432_v45  ;;  %v1431_v47 = vmul.f32 0.03125, %v1429_v46 }
 0x7fd   : > { %v1433_v48 = vadd.f32 1e-12, %v1431_v47 }
 0x7ff   : > { %2206 = vrsqrt.f32 %v1433_v48 }
 0x808   : > { %v2205_v49 = vpop.eup %2204 }
 0x809   : > { %v1436_v50 = vmul.f32 %v2205_v49, %v1420_v35 }
 0x80b   : > { %v1444_v54 = vmul.f32 %v1986_v51, %v1436_v50 }
 0x80c   : > { %v2207_v52 = vpop.eup %2206 }
 0x80d   : > { %v1437_v53 = vmul.f32 %v2207_v52, %v1421_v33  ;;  %v1452_v57 = vadd.f32 %v1987_v55, %v1444_v54  ;;  %v1998_v54 = vld [vmem:[%s756_s23] ss:$0 sm:$0xff] }
 0x80f   : > { %v1445_v56 = vmul.f32 %v1986_v51, %v1437_v53 }
 0x811   : > { %v1453_v58 = vadd.f32 %v1987_v55, %v1445_v56  ;;  %v1999_v56 = vld [vmem:[%s759_s17] ss:$0 sm:$0xff] }
 0x813   : > { %v1454_v59 = vpack.c.bf16 %v1453_v58, %v1452_v57 }
 0x815   : > { %2120 = vmatmul.mubr.msk.bf16.vlgmr.msra.gmra.mxu0 %vm841_vm2, %v1454_v59 }
 0x8d5   : > { %v1515_v1 = vpop.f32.mrf.mxu0 }
 0x8d6   : > { %v1516_v2 = vadd.f32 %v1988_v0, %v1515_v1 }
 0x8d7   : > { %v2121_v3 = vpop.f32.mrf.mxu0 }
 0x8d8   : > { %v1524_v4 = vmul.f32 0.044715, %v1516_v2  ;;  %v1522_v19 = vmul.f32 0.5, %v1516_v2 }
 0x8d9   : > { %v1518_v5 = vpop.f32.mrf.mxu0 }
 0x8da   : > { %v1526_v6 = vmul.f32 %v1524_v4, %v1516_v2  ;;  %v1519_v7 = vadd.f32 %v1988_v0, %v1518_v5 }
 0x8db   : > { %v2122_v8 = vpop.f32.mrf.mxu0 }
 0x8dc   : > { %v1528_v9 = vmul.f32 %v1526_v6, %v1516_v2  ;;  %v1525_v10 = vmul.f32 0.044715, %v1519_v7  ;;  %v1523_v20 = vmul.f32 0.5, %v1519_v7 }
 0x8de   : > { %v1530_v11 = vadd.f32 %v1528_v9, %v1516_v2  ;;  %v1527_v12 = vmul.f32 %v1525_v10, %v1519_v7 }
 0x8e0   : > { %v1532_v13 = vmul.f32 0.7978846, %v1530_v11  ;;  %v1529_v31 = vmul.f32 %v1527_v12, %v1519_v7 }
 0x8e2   : > { %2208 = vtanh.f32 %v1532_v13  ;;  %v1531_v14 = vadd.f32 %v1529_v31, %v1519_v7 }
 0x8e4   : > { %v1533_v15 = vmul.f32 0.7978846, %v1531_v14 }
 0x8e6   : > { %2210 = vtanh.f32 %v1533_v15 }
 0x8ef   : > { %v2209_v16 = vpop.eup %2208 }
 0x8f0   : > { %v1536_v17 = vadd.f32 1.0, %v2209_v16 }
 0x8f2   : > { %v1538_v22 = vmul.f32 %v1536_v17, %v1522_v19 }
 0x8f3   : > { %v2211_v18 = vpop.eup %2210 }
 0x8f4   : > { %v1537_v21 = vadd.f32 1.0, %v2211_v18 }
 0x8f6   : > { %v1539_v23 = vmul.f32 %v1537_v21, %v1523_v20 }
 0x8f8   : > { %v1540_v24 = vpack.c.bf16 %v1539_v23, %v1538_v22 }
 0x8fa   : > { %2132 = vmatmul.mubr.msk.bf16.vlgmr.msra.gmra.mxu1 %vm1580_vm6, %v1540_v24 }
 0x9ba   : > { %v1618_v26 = vpop.f32.mrf.mxu1 }
 0x9bb   : > { %v1619_v27 = vadd.f32 %v1992_v25, %v1618_v26 }
 0x9bc   : > { %v2133_v28 = vpop.f32.mrf.mxu1 }
 0x9bd   : > { %v1625_v29 = vadd.f32 %v1619_v27, %v1452_v57 }
 0x9be   : > { %v1621_v30 = vpop.f32.mrf.mxu1 }
 0x9bf   : > { %v1622_v32 = vadd.f32 %v1992_v25, %v1621_v30  ;;  %v1629_v35 = vsel %vm841_vm2, %v1625_v29, 0.0 }
 0x9c0   : > { %1630 = vadd.xlane.f32.xlu0 %v1629_v35  ;;  %v2134_v36 = vpop.f32.mrf.mxu1 }
 0x9c1   : > { %v1626_v37 = vadd.f32 %v1622_v32, %v1453_v58 }
 0x9c3   : > { %v1632_v38 = vsel %vm841_vm2, %v1626_v37, 0.0 }
 0x9c4   : > { %1633 = vadd.xlane.f32.xlu1 %v1632_v38 }
 0xa49   : > { %v1631_v33 = vpop.xlane.xlu0 %1630 }
 0xa4a   : > { %v1635_v39 = vmul.f32 0.03125, %v1631_v33 }
 0xa4c   : > { %v1637_v40 = vsub.f32 %v1625_v29, %v1635_v39 }
 0xa4d   : > { %v1634_v41 = vpop.xlane.xlu1 %1633 }
 0xa4e   : > { %v1636_v34 = vmul.f32 0.03125, %v1634_v41  ;;  %v1639_v42 = vmul.f32 %v1637_v40, %v1637_v40 }
 0xa50   : > { %v1638_v43 = vsub.f32 %v1626_v37, %v1636_v34  ;;  %v1641_v44 = vsel %vm841_vm2, %v1639_v42, 0.0 }
 0xa51   : > { %1642 = vadd.xlane.f32.xlu0 %v1641_v44 }
 0xa52   : > { %v1640_v45 = vmul.f32 %v1638_v43, %v1638_v43 }
 0xa54   : > { %v1644_v46 = vsel %vm841_vm2, %v1640_v45, 0.0 }
 0xa55   : > { %1645 = vadd.xlane.f32.xlu1 %v1644_v46 }
 0xada   : > { %v1643_v47 = vpop.xlane.xlu0 %1642 }
 0xadb   : > { %v1647_v48 = vmul.f32 0.03125, %v1643_v47 }
 0xadd   : > { %v1649_v49 = vadd.f32 1e-12, %v1647_v48 }
 0xade   : > { %v1646_v50 = vpop.xlane.xlu1 %1645 }
 0xadf   : > { %2212 = vrsqrt.f32 %v1649_v49  ;;  %v1648_v51 = vmul.f32 0.03125, %v1646_v50 }
 0xae1   : > { %v1650_v52 = vadd.f32 1e-12, %v1648_v51 }
 0xae3   : > { %2214 = vrsqrt.f32 %v1650_v52 }
 0xaec   : > { %v2213_v53 = vpop.eup %2212 }
 0xaed   : > { %v1653_v55 = vmul.f32 %v2213_v53, %v1637_v40 }
 0xaef   : > { %v1661_v57 = vmul.f32 %v1998_v54, %v1653_v55 }
 0xaf0   : > { %v2215_v58 = vpop.eup %2214 }
 0xaf1   : > { %v1669_v59 = vadd.f32 %v1999_v56, %v1661_v57  ;;  %v1654_v60 = vmul.f32 %v2215_v58, %v1638_v43 }
 0xaf3   : > { %1671 = vst.msk [vmem:[#allocation2] sm:$0xff] %vm841_vm2, %v1669_v59  ;;  %v1662_v61 = vmul.f32 %v1998_v54, %v1654_v60  ;;  %1676 = sbr.rel (%p2000_p5) target bundleno = 3227 (0xc9b), region = 104 }
 0xaf5   : > { %v1670_v62 = vadd.f32 %v1999_v56, %v1662_v61 }
 0xaf7   : > { %1672 = vst.msk [vmem:[#allocation2 + $0x8] sm:$0xff] %vm841_vm2, %v1670_v62 }
 0xaf8   : > { %v2216_v63 = vld [vmem:[%s2655_s21 + $0x8] sm:$0xff]   ;;  %v2238_v0 = vmov 0.0   ;;  %v2217_v1 = vld [vmem:[%s2655_s21] sm:$0xff]   ;;  %vm2239_vm7 = vmmov 0   ;;  %v1678_v2 = vrot.slane %v1670_v62, 7  ;;  %vm1680_vm8 = vcmask 1040384  }
 0xaf9   : > { %2135 = vmatprep.subr.bf16.mxu0 %v2238_v0  ;;  %2143 = vmatprep.subr.bf16.mxu1 %v2238_v0  ;;  %v2218_v5 = vld [vmem:[%s2656_s25 + $0x8] sm:$0xff]   ;;  %v2219_v6 = vld [vmem:[%s2656_s25] sm:$0xff]   ;;  %vm1817_vm9 = vcmask 9216  }
 0xafa   : > { %2136 = vmatpush3.bf16.msra.mxu0 %v2216_v63  ;;  %2139 = vmatprep.mubr.msk.bf16.mxu0 %vm2239_vm7, %v2238_v0  ;;  %v1681_v3 = vsel %vm1680_vm8, %v1669_v59, %v1678_v2  ;;  %v2001_v7 = vld [vmem:[%s2657_s15] ss:$0 sm:$0xff] }
 0xafb   : > { %2137 = vmatprep.subr.bf16.mxu0 %v2238_v0  ;;  %2147 = vmatprep.mubr.msk.bf16.mxu1 %vm2239_vm7, %v2238_v0  ;;  %v1682_v4 = vpack.c.bf16 %v1681_v3, %v1681_v3  ;;  %v2005_v14 = vld [vmem:[%s2658_s2] ss:$0 sm:$0xff] }
 0xafc   : > { %2144 = vmatpush3.bf16.msra.mxu1 %v2218_v5 }
 0xafd   : > { %2145 = vmatprep.subr.bf16.mxu1 %v2238_v0 }
 0xafe   : > { %2138 = vmatpush3.bf16.msra.mxu0 %v2217_v1 }
 0xb00   : > { %2146 = vmatpush3.bf16.msra.mxu1 %v2219_v6 }
 0xb01   : > { %2140 = vmatmul.mubr.msk.bf16.vlgmr.msra.gmra.mxu0 %vm841_vm2, %v1682_v4 }
 0xbc1   : > { %v1743_v8 = vpop.f32.mrf.mxu0 }
 0xbc2   : > { %v1744_v9 = vadd.f32 %v2001_v7, %v1743_v8 }
 0xbc3   : > { %v2141_v10 = vpop.f32.mrf.mxu0 }
 0xbc4   : > { %2220 = vtanh.f32 %v1744_v9 }
 0xbc5   : > { %v1746_v11 = vpop.f32.mrf.mxu0 }
 0xbc7   : > { %v2142_v12 = vpop.f32.mrf.mxu0 }
 0xbd1   : > { %v2221_v13 = vpop.eup %2220 }
 0xbd2   : > { %v1750_v31 = vpack.c.bf16 %v2221_v13, %v2221_v13 }
 0xbd4   : > { %2148 = vmatmul.mubr.msk.bf16.vlgmr.msra.gmra.mxu1 %vm841_vm2, %v1750_v31 }
 0xc94   : > { %v1811_v15 = vpop.f32.mrf.mxu1 }
 0xc95   : > { %v1812_v16 = vadd.f32 %v2005_v14, %v1811_v15 }
 0xc96   : > { %v2149_v17 = vpop.f32.mrf.mxu1 }
 0xc97   : > { %1818 = vst.msk [vmem:[%s2659_s28] sm:$0x3] %vm1817_vm9, %v1812_v16 }
 0xc98   : > { %v1814_v18 = vpop.f32.mrf.mxu1 }
 0xc9a   : > { %v2150_v19 = vpop.f32.mrf.mxu1 }
 0xc9b PF: > { %s2660_s18 = sld [smem:[#allocation3_spill]] }
 0xca1   : > { %s29_s0 = sadd.s32 1, %s2660_s18  }
 0xca2   : > { %p26_p6 = scmp.ge.s32.totalorder %s29_s0, 4  }
 0xca4   :  { %28 = sbr.rel (!%p26_p6) target bundleno = 11 (0xb), region = 163 }

</bundles_post_ra>
